<compile_context>
chip_gen: v5e
topology: v5e:2x2
jax: 0.10.0
libtpu: 0.0.40
codegen_flags: <defaults>
</compile_context>

<pallas_src>
import math
import jax
import jax.numpy as jnp
from jax import lax
from jax.experimental import pallas as pl
from jax.experimental.pallas import tpu as pltpu

# ----------------------------- config ---------------------------------------
VOCAB = 64
HIDDEN = 32
N_LAYERS = 2
N_HEADS = 2
HEAD_DIM = HIDDEN // N_HEADS
INTERMEDIATE = 64
TYPE_VOCAB = 2
NUM_LABELS = 2
LN_EPS = 1e-12
SEQ = 8            # power of two: kernel derives position ids with `& (SEQ - 1)`
BATCH = 2
BS = BATCH * SEQ
LANE = 128         # lane-dense padded width for the classifier-head output
OUT_ROWS = 8       # sublane-aligned rows for the padded logits block

# packed embedding-table row layout: [word | type | position(:SEQ)]
POS_OFF = VOCAB + TYPE_VOCAB
EMB_ROWS = POS_OFF + SEQ

# packed width-H vector slab (LN gammas/betas + output biases + pooler bias)
V_EMB_G, V_EMB_B = 0, 1


def _vbase(l):
    # per-layer rows: +0 attn-out bias, +1 ln1_g, +2 ln1_b, +3 ffn2 bias, +4 ln2_g, +5 ln2_b
    return 2 + 6 * l


V_POOL_B = 2 + 6 * N_LAYERS
NVEC = V_POOL_B + 1


# ----------------------------- fused Pallas kernel ---------------------------
def _bert_kernel(ids_ref, type_ref, mask_ref,
                 emb_tab_ref, attn_w_ref, attn_b_ref,
                 ffn_w_ref, ffn_b1_ref, vec_ref,
                 pool_w_ref, cls_wb_ref, o_ref):
    """Single grid step = full BERT forward for all B*S rows (everything VMEM resident)."""
    f32 = jnp.float32

    def layernorm(x, g, b):
        mean = jnp.mean(x, axis=-1, keepdims=True)
        var = jnp.mean((x - mean) ** 2, axis=-1, keepdims=True)
        return (x - mean) * lax.rsqrt(var + LN_EPS) * g + b

    def wdot(a, w):        # a @ w : bf16 MXU inputs, f32 accumulation
        return jnp.dot(a.astype(w.dtype), w, preferred_element_type=f32)

    def wdot_t(a, w_t):    # a @ w_t.T (contract last dims): bf16 inputs, f32 acc
        return lax.dot_general(a.astype(w_t.dtype), w_t,
                               (((1,), (1,)), ((), ())),
                               preferred_element_type=f32)

    # ---- embeddings: one combined one-hot matmul on the otherwise-idle MXU ----
    lane = lax.broadcasted_iota(jnp.int32, (BS, EMB_ROWS), 1)
    row = lax.broadcasted_iota(jnp.int32, (BS, EMB_ROWS), 0)
    onehot = ((lane == ids_ref[...])                          # word rows
              | (lane == type_ref[...] + VOCAB)               # token-type rows
              | (lane == (row & (SEQ - 1)) + POS_OFF)         # position rows
              ).astype(f32)
    x = layernorm(wdot(onehot, emb_tab_ref[...]),
                  vec_ref[V_EMB_G], vec_ref[V_EMB_B])                      # (BS, H)

    add_mask = (1.0 - mask_ref[...]) * -1e9                               # (B, S)

    for l in range(N_LAYERS):                                             # static unroll
        base = _vbase(l)

        # ---- attention: per-head matmuls at lane offset 0, per-batch softmax,
        #      per-head accumulation of the output projection (no head concat) ----
        attn_out = jnp.zeros((BS, HIDDEN), f32)
        for h in range(N_HEADS):
            q = wdot(x, attn_w_ref[l, 0, h]) + attn_b_ref[l, 0, h]   # scale folded into Wq
            k = wdot(x, attn_w_ref[l, 1, h]) + attn_b_ref[l, 1, h]
            v = wdot(x, attn_w_ref[l, 2, h]) + attn_b_ref[l, 2, h]
            ctx_rows = []
            for b in range(BATCH):                                   # per-batch mask only
                r0 = b * SEQ
                s = lax.dot_general(q[r0:r0 + SEQ], k[r0:r0 + SEQ],
                                    (((1,), (1,)), ((), ())),
                                    preferred_element_type=f32)       # (S, S)
                s = s + add_mask[b]
                s = s - jnp.max(s, axis=-1, keepdims=True)
                p = jnp.exp(s)
                p = p * pl.reciprocal(jnp.sum(p, axis=-1, keepdims=True), approx=True)
                ctx_rows.append(jnp.dot(p, v[r0:r0 + SEQ],
                                        preferred_element_type=f32))  # (S, HEAD_DIM)
            ctx = jnp.concatenate(ctx_rows, axis=0)                   # (BS, HEAD_DIM)
            attn_out = attn_out + wdot_t(ctx, attn_w_ref[l, 3, h])    # += ctx @ Wo_h
        x = layernorm(x + attn_out + vec_ref[base + 0],
                      vec_ref[base + 1], vec_ref[base + 2])

        # ---- FFN (tanh-approx GELU -> EUP) + residual + LN ----
        h1 = wdot(x, ffn_w_ref[l, 0]) + ffn_b1_ref[l, 0]
        # TODO(synk): HF BERT default is exact erf GELU; tanh approximation used here.
        h1 = jax.nn.gelu(h1, approximate=True)
        ffn = wdot_t(h1, ffn_w_ref[l, 1]) + vec_ref[base + 3]
        x = layernorm(x + ffn, vec_ref[base + 4], vec_ref[base + 5])

    # ---- pooler (tanh on each batch's CLS row) + classifier, lane-dense output ----
    cls_rows = jnp.concatenate([x[b * SEQ:b * SEQ + 1] for b in range(BATCH)], axis=0)
    pooled = jnp.tanh(wdot(cls_rows, pool_w_ref[...]) + vec_ref[V_POOL_B])   # (B, H)
    logits = jnp.dot(pooled, cls_wb_ref[0:HIDDEN, :],
                     preferred_element_type=f32) + cls_wb_ref[HIDDEN]        # (B, LANE)
    o_ref[...] = jnp.concatenate(
        [logits, jnp.zeros((OUT_ROWS - BATCH, LANE), f32)], axis=0)          # one full vst


# ----------------------------- parameters ------------------------------------
def init_params(key):
    def nrm(k, shape):
        return jax.random.normal(k, shape, jnp.float32) * 0.02

    keys = iter(jax.random.split(key, 16))

    # packed embedding table rows: [word | type | position(:SEQ)]
    word_emb = nrm(next(keys), (VOCAB, HIDDEN))
    type_emb = nrm(next(keys), (TYPE_VOCAB, HIDDEN))
    pos_emb = nrm(next(keys), (SEQ, HIDDEN))
    emb_tab = jnp.concatenate([word_emb, type_emb, pos_emb], axis=0)   # (EMB_ROWS, H)

    # per-head attention weights; Q pre-scaled by 1/sqrt(HEAD_DIM); Wo stored transposed
    scale = 1.0 / math.sqrt(HEAD_DIM)
    wq = nrm(next(keys), (N_LAYERS, HIDDEN, HIDDEN)) * scale
    wk = nrm(next(keys), (N_LAYERS, HIDDEN, HIDDEN))
    wv = nrm(next(keys), (N_LAYERS, HIDDEN, HIDDEN))
    wo = nrm(next(keys), (N_LAYERS, HIDDEN, HIDDEN))

    def per_head_in(w):      # (L,H,H) -> (L,NH,H,HD): output-column block per head
        return w.reshape(N_LAYERS, HIDDEN, N_HEADS, HEAD_DIM).transpose(0, 2, 1, 3)

    def per_head_out_t(w):   # (L,H,H) -> (L,NH,H,HD): Wo row block per head, transposed
        return w.reshape(N_LAYERS, N_HEADS, HEAD_DIM, HIDDEN).transpose(0, 1, 3, 2)

    attn_w = jnp.stack([per_head_in(wq), per_head_in(wk),
                        per_head_in(wv), per_head_out_t(wo)],
                       axis=1).astype(jnp.bfloat16)                    # (L,4,NH,H,HD)
    # per-head q/k/v biases (zero init; a real checkpoint's q-bias also carries the scale)
    attn_b = jnp.zeros((N_LAYERS, 3, N_HEADS, 1, HEAD_DIM), jnp.float32)

    # FFN weights packed as [W1 | W2^T] in one slab
    w1 = nrm(next(keys), (N_LAYERS, HIDDEN, INTERMEDIATE))
    w2 = nrm(next(keys), (N_LAYERS, INTERMEDIATE, HIDDEN))
    ffn_w = jnp.stack([w1, w2.transpose(0, 2, 1)], axis=1).astype(jnp.bfloat16)
    ffn_b1 = jnp.zeros((N_LAYERS, 1, INTERMEDIATE), jnp.float32)

    # all width-H LN/bias vectors packed into one (NVEC, H) slab
    vec = jnp.zeros((NVEC, HIDDEN), jnp.float32)
    vec = vec.at[V_EMB_G].set(1.0)
    for l in range(N_LAYERS):
        vec = vec.at[_vbase(l) + 1].set(1.0)   # ln1 gamma
        vec = vec.at[_vbase(l) + 4].set(1.0)   # ln2 gamma
    # (betas, attention/FFN output biases, pooler bias remain zero-initialized)

    # pooler + classifier; classifier weight and bias packed lane-dense into one slab
    pool_w = nrm(next(keys), (HIDDEN, HIDDEN)).astype(jnp.bfloat16)
    cls_w = nrm(next(keys), (HIDDEN, NUM_LABELS))
    cls_wb = jnp.zeros((HIDDEN + 1, LANE), jnp.float32)
    cls_wb = cls_wb.at[:HIDDEN, :NUM_LABELS].set(cls_w)
    # row HIDDEN = classifier bias (zero here; real checkpoints write cols 0..NUM_LABELS-1)

    return dict(emb_tab=emb_tab.astype(jnp.bfloat16), attn_w=attn_w, attn_b=attn_b,
                ffn_w=ffn_w, ffn_b1=ffn_b1, vec=vec, pool_w=pool_w, cls_wb=cls_wb)


# ----------------------------- forward ---------------------------------------
def bert_classifier_forward(params, input_ids, attention_mask, token_type_ids):
    assert input_ids.shape == (BATCH, SEQ)
    ids = input_ids.reshape(BS, 1).astype(jnp.int32)
    types = token_type_ids.reshape(BS, 1).astype(jnp.int32)
    mask = attention_mask.astype(jnp.float32)                      # (B, S)

    args = (ids, types, mask,
            params["emb_tab"], params["attn_w"], params["attn_b"],
            params["ffn_w"], params["ffn_b1"], params["vec"],
            params["pool_w"], params["cls_wb"])

    def full(a):
        nd = a.ndim
        return pl.BlockSpec(a.shape, lambda i, _nd=nd: (0,) * _nd)

    # TODO(synk): dropout omitted (eval-mode logits only).
    out = pl.pallas_call(
        _bert_kernel,
        out_shape=jax.ShapeDtypeStruct((OUT_ROWS, LANE), jnp.float32),
        grid=(1,),                                # single step: one weight prologue,
        in_specs=[full(a) for a in args],         # no per-batch grid-step overhead
        out_specs=pl.BlockSpec((OUT_ROWS, LANE), lambda i: (0, 0)),
        compiler_params=pltpu.CompilerParams(
            dimension_semantics=("arbitrary",)),
    )(*args)
    return out[:BATCH, :NUM_LABELS]                                # (B, NUM_LABELS)


# ----------------------------- main ------------------------------------------
if __name__ == "__main__":
    key = jax.random.PRNGKey(0)
    kp, kid = jax.random.split(key)
    params = init_params(kp)

    input_ids = jax.random.randint(kid, (BATCH, SEQ), 0, VOCAB, dtype=jnp.int32)
    attention_mask = jnp.ones((BATCH, SEQ), jnp.int32)
    token_type_ids = jnp.zeros((BATCH, SEQ), jnp.int32)

    logits = bert_classifier_forward(params, input_ids, attention_mask, token_type_ids)
    logits = jax.block_until_ready(logits)
    assert logits.shape == (BATCH, NUM_LABELS)
    assert bool(jnp.all(jnp.isfinite(logits)))
    print("KERNEL_OK")
</pallas_src>

<mosaic_0001>
module attributes {stable_mosaic.version = 11 : i64} {
  func.func @_bert_kernel(%arg0: i32, %arg1: memref<16x1xi32, #tpu.memory_space<vmem>>, %arg2: memref<16x1xi32, #tpu.memory_space<vmem>>, %arg3: memref<2x8xf32, #tpu.memory_space<vmem>>, %arg4: memref<74x32xbf16, #tpu.memory_space<vmem>>, %arg5: memref<2x4x2x32x16xbf16, #tpu.memory_space<vmem>>, %arg6: memref<2x3x2x1x16xf32, #tpu.memory_space<vmem>>, %arg7: memref<2x2x32x64xbf16, #tpu.memory_space<vmem>>, %arg8: memref<2x1x64xf32, #tpu.memory_space<vmem>>, %arg9: memref<15x32xf32, #tpu.memory_space<vmem>>, %arg10: memref<32x32xbf16, #tpu.memory_space<vmem>>, %arg11: memref<33x128xf32, #tpu.memory_space<vmem>>, %arg12: memref<8x128xf32, #tpu.memory_space<vmem>>) attributes {dimension_semantics = [#tpu.dimension_semantics<arbitrary>], iteration_bounds = array<i64: 1>, scalar_prefetch = 0 : i64, scratch_operands = 0 : i64, tpu.core_type = #tpu.core_type<tc>, window_params = [{pipeline_mode = #tpu.pipeline_mode<synchronous>, transform_indices = @transform_0, window_bounds = array<i64: 16, 1>}, {pipeline_mode = #tpu.pipeline_mode<synchronous>, transform_indices = @transform_1, window_bounds = array<i64: 16, 1>}, {pipeline_mode = #tpu.pipeline_mode<synchronous>, transform_indices = @transform_2, window_bounds = array<i64: 2, 8>}, {pipeline_mode = #tpu.pipeline_mode<synchronous>, transform_indices = @transform_3, window_bounds = array<i64: 74, 32>}, {pipeline_mode = #tpu.pipeline_mode<synchronous>, transform_indices = @transform_4, window_bounds = array<i64: 2, 4, 2, 32, 16>}, {pipeline_mode = #tpu.pipeline_mode<synchronous>, transform_indices = @transform_5, window_bounds = array<i64: 2, 3, 2, 1, 16>}, {pipeline_mode = #tpu.pipeline_mode<synchronous>, transform_indices = @transform_6, window_bounds = array<i64: 2, 2, 32, 64>}, {pipeline_mode = #tpu.pipeline_mode<synchronous>, transform_indices = @transform_7, window_bounds = array<i64: 2, 1, 64>}, {pipeline_mode = #tpu.pipeline_mode<synchronous>, transform_indices = @transform_8, window_bounds = array<i64: 15, 32>}, {pipeline_mode = #tpu.pipeline_mode<synchronous>, transform_indices = @transform_9, window_bounds = array<i64: 32, 32>}, {pipeline_mode = #tpu.pipeline_mode<synchronous>, transform_indices = @transform_10, window_bounds = array<i64: 33, 128>}, {pipeline_mode = #tpu.pipeline_mode<synchronous>, transform_indices = @transform_11, window_bounds = array<i64: 8, 128>}]} {
    %0 = tpu.iota {dimensions = array<i32: 1>} : vector<16x74xi32>
    %1 = tpu.iota {dimensions = array<i32: 0>} : vector<16x74xi32>
    %c0 = arith.constant 0 : index
    %c0_0 = arith.constant 0 : index
    %2 = vector.load %arg1[%c0, %c0_0] : memref<16x1xi32, #tpu.memory_space<vmem>>, vector<16x1xi32>
    %3 = vector.broadcast %2 : vector<16x1xi32> to vector<16x74xi32>
    %4 = arith.cmpi eq, %0, %3 : vector<16x74xi32>
    %c0_1 = arith.constant 0 : index
    %c0_2 = arith.constant 0 : index
    %5 = vector.load %arg2[%c0_1, %c0_2] : memref<16x1xi32, #tpu.memory_space<vmem>>, vector<16x1xi32>
    %c64_i32 = arith.constant 64 : i32
    %6 = vector.broadcast %c64_i32 : i32 to vector<16x1xi32>
    %7 = arith.addi %5, %6 : vector<16x1xi32>
    %8 = vector.broadcast %7 : vector<16x1xi32> to vector<16x74xi32>
    %9 = arith.cmpi eq, %0, %8 : vector<16x74xi32>
    %10 = arith.ori %4, %9 : vector<16x74xi1>
    %c7_i32 = arith.constant 7 : i32
    %11 = vector.broadcast %c7_i32 : i32 to vector<16x74xi32>
    %12 = arith.andi %1, %11 : vector<16x74xi32>
    %c66_i32 = arith.constant 66 : i32
    %13 = vector.broadcast %c66_i32 : i32 to vector<16x74xi32>
    %14 = arith.addi %12, %13 : vector<16x74xi32>
    %15 = arith.cmpi eq, %0, %14 : vector<16x74xi32>
    %16 = arith.ori %10, %15 : vector<16x74xi1>
    %17 = arith.extui %16 : vector<16x74xi1> to vector<16x74xi32>
    %18 = arith.sitofp %17 : vector<16x74xi32> to vector<16x74xf32>
    %c0_3 = arith.constant 0 : index
    %c0_4 = arith.constant 0 : index
    %19 = vector.load %arg4[%c0_3, %c0_4] : memref<74x32xbf16, #tpu.memory_space<vmem>>, vector<74x32xbf16>
    %20 = arith.truncf %18 : vector<16x74xf32> to vector<16x74xbf16>
    %cst = arith.constant dense<0.000000e+00> : vector<16x32xf32>
    %21 = tpu.matmul %20, %19, %cst {dimension_numbers = #tpu.dot_dimension_numbers<[1], [0], [0], [1], [0, 0, 1, 1], [], []>} : vector<16x74xbf16>, vector<74x32xbf16>, vector<16x32xf32> -> vector<16x32xf32>
    %c0_5 = arith.constant 0 : index
    %c0_6 = arith.constant 0 : index
    %22 = vector.load %arg9[%c0_5, %c0_6] : memref<15x32xf32, #tpu.memory_space<vmem>>, vector<1x32xf32>
    %23 = vector.shape_cast %22 : vector<1x32xf32> to vector<32xf32>
    %c1 = arith.constant 1 : index
    %c0_7 = arith.constant 0 : index
    %24 = vector.load %arg9[%c1, %c0_7] : memref<15x32xf32, #tpu.memory_space<vmem>>, vector<1x32xf32>
    %25 = vector.shape_cast %24 : vector<1x32xf32> to vector<32xf32>
    %cst_8 = arith.constant dense<0.000000e+00> : vector<16xf32>
    %26 = vector.multi_reduction <add>, %21, %cst_8 [1] : vector<16x32xf32> to vector<16xf32>
    %27 = vector.shape_cast %26 : vector<16xf32> to vector<16x1xf32>
    %cst_9 = arith.constant 3.200000e+01 : f32
    %28 = vector.broadcast %cst_9 : f32 to vector<16x1xf32>
    %29 = arith.divf %27, %28 : vector<16x1xf32>
    %30 = vector.broadcast %29 : vector<16x1xf32> to vector<16x32xf32>
    %31 = arith.subf %21, %30 : vector<16x32xf32>
    %32 = arith.mulf %31, %31 : vector<16x32xf32>
    %cst_10 = arith.constant dense<0.000000e+00> : vector<16xf32>
    %33 = vector.multi_reduction <add>, %32, %cst_10 [1] : vector<16x32xf32> to vector<16xf32>
    %34 = vector.shape_cast %33 : vector<16xf32> to vector<16x1xf32>
    %cst_11 = arith.constant 3.200000e+01 : f32
    %35 = vector.broadcast %cst_11 : f32 to vector<16x1xf32>
    %36 = arith.divf %34, %35 : vector<16x1xf32>
    %37 = vector.broadcast %29 : vector<16x1xf32> to vector<16x32xf32>
    %38 = arith.subf %21, %37 : vector<16x32xf32>
    %cst_12 = arith.constant 9.99999996E-13 : f32
    %39 = vector.broadcast %cst_12 : f32 to vector<16x1xf32>
    %40 = arith.addf %36, %39 : vector<16x1xf32>
    %41 = math.rsqrt %40 : vector<16x1xf32>
    %42 = vector.broadcast %41 : vector<16x1xf32> to vector<16x32xf32>
    %43 = arith.mulf %38, %42 : vector<16x32xf32>
    %44 = vector.shape_cast %23 : vector<32xf32> to vector<1x32xf32>
    %45 = vector.broadcast %44 : vector<1x32xf32> to vector<16x32xf32>
    %46 = arith.mulf %43, %45 : vector<16x32xf32>
    %47 = vector.shape_cast %25 : vector<32xf32> to vector<1x32xf32>
    %48 = vector.broadcast %47 : vector<1x32xf32> to vector<16x32xf32>
    %49 = arith.addf %46, %48 : vector<16x32xf32>
    %c0_13 = arith.constant 0 : index
    %c0_14 = arith.constant 0 : index
    %50 = vector.load %arg3[%c0_13, %c0_14] : memref<2x8xf32, #tpu.memory_space<vmem>>, vector<2x8xf32>
    %cst_15 = arith.constant 1.000000e+00 : f32
    %51 = vector.broadcast %cst_15 : f32 to vector<2x8xf32>
    %52 = arith.subf %51, %50 : vector<2x8xf32>
    %cst_16 = arith.constant -1.000000e+09 : f32
    %53 = vector.broadcast %cst_16 : f32 to vector<2x8xf32>
    %54 = arith.mulf %52, %53 : vector<2x8xf32>
    %cst_17 = arith.constant 0.000000e+00 : f32
    %55 = vector.broadcast %cst_17 : f32 to vector<16x32xf32>
    %c0_18 = arith.constant 0 : index
    %c0_19 = arith.constant 0 : index
    %c0_20 = arith.constant 0 : index
    %c0_21 = arith.constant 0 : index
    %c0_22 = arith.constant 0 : index
    %56 = vector.load %arg5[%c0_18, %c0_19, %c0_20, %c0_21, %c0_22] : memref<2x4x2x32x16xbf16, #tpu.memory_space<vmem>>, vector<1x1x1x32x16xbf16>
    %57 = vector.shape_cast %56 : vector<1x1x1x32x16xbf16> to vector<32x16xbf16>
    %58 = arith.truncf %49 : vector<16x32xf32> to vector<16x32xbf16>
    %cst_23 = arith.constant dense<0.000000e+00> : vector<16x16xf32>
    %59 = tpu.matmul %58, %57, %cst_23 {dimension_numbers = #tpu.dot_dimension_numbers<[1], [0], [0], [1], [0, 0, 1, 1], [], []>} : vector<16x32xbf16>, vector<32x16xbf16>, vector<16x16xf32> -> vector<16x16xf32>
    %c0_24 = arith.constant 0 : index
    %c0_25 = arith.constant 0 : index
    %c0_26 = arith.constant 0 : index
    %c0_27 = arith.constant 0 : index
    %c0_28 = arith.constant 0 : index
    %60 = vector.load %arg6[%c0_24, %c0_25, %c0_26, %c0_27, %c0_28] : memref<2x3x2x1x16xf32, #tpu.memory_space<vmem>>, vector<1x1x1x1x16xf32>
    %61 = vector.shape_cast %60 : vector<1x1x1x1x16xf32> to vector<1x16xf32>
    %62 = vector.broadcast %61 : vector<1x16xf32> to vector<16x16xf32>
    %63 = arith.addf %59, %62 : vector<16x16xf32>
    %c0_29 = arith.constant 0 : index
    %c1_30 = arith.constant 1 : index
    %c0_31 = arith.constant 0 : index
    %c0_32 = arith.constant 0 : index
    %c0_33 = arith.constant 0 : index
    %64 = vector.load %arg5[%c0_29, %c1_30, %c0_31, %c0_32, %c0_33] : memref<2x4x2x32x16xbf16, #tpu.memory_space<vmem>>, vector<1x1x1x32x16xbf16>
    %65 = vector.shape_cast %64 : vector<1x1x1x32x16xbf16> to vector<32x16xbf16>
    %66 = arith.truncf %49 : vector<16x32xf32> to vector<16x32xbf16>
    %cst_34 = arith.constant dense<0.000000e+00> : vector<16x16xf32>
    %67 = tpu.matmul %66, %65, %cst_34 {dimension_numbers = #tpu.dot_dimension_numbers<[1], [0], [0], [1], [0, 0, 1, 1], [], []>} : vector<16x32xbf16>, vector<32x16xbf16>, vector<16x16xf32> -> vector<16x16xf32>
    %c0_35 = arith.constant 0 : index
    %c1_36 = arith.constant 1 : index
    %c0_37 = arith.constant 0 : index
    %c0_38 = arith.constant 0 : index
    %c0_39 = arith.constant 0 : index
    %68 = vector.load %arg6[%c0_35, %c1_36, %c0_37, %c0_38, %c0_39] : memref<2x3x2x1x16xf32, #tpu.memory_space<vmem>>, vector<1x1x1x1x16xf32>
    %69 = vector.shape_cast %68 : vector<1x1x1x1x16xf32> to vector<1x16xf32>
    %70 = vector.broadcast %69 : vector<1x16xf32> to vector<16x16xf32>
    %71 = arith.addf %67, %70 : vector<16x16xf32>
    %c0_40 = arith.constant 0 : index
    %c2 = arith.constant 2 : index
    %c0_41 = arith.constant 0 : index
    %c0_42 = arith.constant 0 : index
    %c0_43 = arith.constant 0 : index
    %72 = vector.load %arg5[%c0_40, %c2, %c0_41, %c0_42, %c0_43] : memref<2x4x2x32x16xbf16, #tpu.memory_space<vmem>>, vector<1x1x1x32x16xbf16>
    %73 = vector.shape_cast %72 : vector<1x1x1x32x16xbf16> to vector<32x16xbf16>
    %74 = arith.truncf %49 : vector<16x32xf32> to vector<16x32xbf16>
    %cst_44 = arith.constant dense<0.000000e+00> : vector<16x16xf32>
    %75 = tpu.matmul %74, %73, %cst_44 {dimension_numbers = #tpu.dot_dimension_numbers<[1], [0], [0], [1], [0, 0, 1, 1], [], []>} : vector<16x32xbf16>, vector<32x16xbf16>, vector<16x16xf32> -> vector<16x16xf32>
    %c0_45 = arith.constant 0 : index
    %c2_46 = arith.constant 2 : index
    %c0_47 = arith.constant 0 : index
    %c0_48 = arith.constant 0 : index
    %c0_49 = arith.constant 0 : index
    %76 = vector.load %arg6[%c0_45, %c2_46, %c0_47, %c0_48, %c0_49] : memref<2x3x2x1x16xf32, #tpu.memory_space<vmem>>, vector<1x1x1x1x16xf32>
    %77 = vector.shape_cast %76 : vector<1x1x1x1x16xf32> to vector<1x16xf32>
    %78 = vector.broadcast %77 : vector<1x16xf32> to vector<16x16xf32>
    %79 = arith.addf %75, %78 : vector<16x16xf32>
    %80 = vector.extract_strided_slice %63 {offsets = [0, 0], sizes = [8, 16], strides = [1, 1]} : vector<16x16xf32> to vector<8x16xf32>
    %81 = vector.extract_strided_slice %71 {offsets = [0, 0], sizes = [8, 16], strides = [1, 1]} : vector<16x16xf32> to vector<8x16xf32>
    %cst_50 = arith.constant dense<0.000000e+00> : vector<8x8xf32>
    %82 = tpu.matmul %80, %81, %cst_50 {dimension_numbers = #tpu.dot_dimension_numbers<[1], [1], [0], [0], [0, 0, 1, 0], [], []>} : vector<8x16xf32>, vector<8x16xf32>, vector<8x8xf32> -> vector<8x8xf32>
    %83 = vector.extract_strided_slice %54 {offsets = [0, 0], sizes = [1, 8], strides = [1, 1]} : vector<2x8xf32> to vector<1x8xf32>
    %84 = vector.shape_cast %83 : vector<1x8xf32> to vector<8xf32>
    %85 = vector.shape_cast %84 : vector<8xf32> to vector<1x8xf32>
    %86 = vector.broadcast %85 : vector<1x8xf32> to vector<8x8xf32>
    %87 = arith.addf %82, %86 : vector<8x8xf32>
    %cst_51 = arith.constant dense<0xFF800000> : vector<8xf32>
    %88 = vector.multi_reduction <maximumf>, %87, %cst_51 [1] : vector<8x8xf32> to vector<8xf32>
    %89 = vector.shape_cast %88 : vector<8xf32> to vector<8x1xf32>
    %90 = vector.broadcast %89 : vector<8x1xf32> to vector<8x8xf32>
    %91 = arith.subf %87, %90 : vector<8x8xf32>
    %92 = math.exp %91 : vector<8x8xf32>
    %cst_52 = arith.constant dense<0.000000e+00> : vector<8xf32>
    %93 = vector.multi_reduction <add>, %92, %cst_52 [1] : vector<8x8xf32> to vector<8xf32>
    %94 = vector.shape_cast %93 : vector<8xf32> to vector<8x1xf32>
    %95 = tpu.reciprocal %94 {approx = true} : vector<8x1xf32> -> vector<8x1xf32>
    %96 = vector.broadcast %95 : vector<8x1xf32> to vector<8x8xf32>
    %97 = arith.mulf %92, %96 : vector<8x8xf32>
    %98 = vector.extract_strided_slice %79 {offsets = [0, 0], sizes = [8, 16], strides = [1, 1]} : vector<16x16xf32> to vector<8x16xf32>
    %cst_53 = arith.constant dense<0.000000e+00> : vector<8x16xf32>
    %99 = tpu.matmul %97, %98, %cst_53 {dimension_numbers = #tpu.dot_dimension_numbers<[1], [0], [0], [1], [0, 0, 1, 1], [], []>} : vector<8x8xf32>, vector<8x16xf32>, vector<8x16xf32> -> vector<8x16xf32>
    %100 = vector.extract_strided_slice %63 {offsets = [8, 0], sizes = [8, 16], strides = [1, 1]} : vector<16x16xf32> to vector<8x16xf32>
    %101 = vector.extract_strided_slice %71 {offsets = [8, 0], sizes = [8, 16], strides = [1, 1]} : vector<16x16xf32> to vector<8x16xf32>
    %cst_54 = arith.constant dense<0.000000e+00> : vector<8x8xf32>
    %102 = tpu.matmul %100, %101, %cst_54 {dimension_numbers = #tpu.dot_dimension_numbers<[1], [1], [0], [0], [0, 0, 1, 0], [], []>} : vector<8x16xf32>, vector<8x16xf32>, vector<8x8xf32> -> vector<8x8xf32>
    %103 = vector.extract_strided_slice %54 {offsets = [1, 0], sizes = [1, 8], strides = [1, 1]} : vector<2x8xf32> to vector<1x8xf32>
    %104 = vector.shape_cast %103 : vector<1x8xf32> to vector<8xf32>
    %105 = vector.shape_cast %104 : vector<8xf32> to vector<1x8xf32>
    %106 = vector.broadcast %105 : vector<1x8xf32> to vector<8x8xf32>
    %107 = arith.addf %102, %106 : vector<8x8xf32>
    %cst_55 = arith.constant dense<0xFF800000> : vector<8xf32>
    %108 = vector.multi_reduction <maximumf>, %107, %cst_55 [1] : vector<8x8xf32> to vector<8xf32>
    %109 = vector.shape_cast %108 : vector<8xf32> to vector<8x1xf32>
    %110 = vector.broadcast %109 : vector<8x1xf32> to vector<8x8xf32>
    %111 = arith.subf %107, %110 : vector<8x8xf32>
    %112 = math.exp %111 : vector<8x8xf32>
    %cst_56 = arith.constant dense<0.000000e+00> : vector<8xf32>
    %113 = vector.multi_reduction <add>, %112, %cst_56 [1] : vector<8x8xf32> to vector<8xf32>
    %114 = vector.shape_cast %113 : vector<8xf32> to vector<8x1xf32>
    %115 = tpu.reciprocal %114 {approx = true} : vector<8x1xf32> -> vector<8x1xf32>
    %116 = vector.broadcast %115 : vector<8x1xf32> to vector<8x8xf32>
    %117 = arith.mulf %112, %116 : vector<8x8xf32>
    %118 = vector.extract_strided_slice %79 {offsets = [8, 0], sizes = [8, 16], strides = [1, 1]} : vector<16x16xf32> to vector<8x16xf32>
    %cst_57 = arith.constant dense<0.000000e+00> : vector<8x16xf32>
    %119 = tpu.matmul %117, %118, %cst_57 {dimension_numbers = #tpu.dot_dimension_numbers<[1], [0], [0], [1], [0, 0, 1, 1], [], []>} : vector<8x8xf32>, vector<8x16xf32>, vector<8x16xf32> -> vector<8x16xf32>
    %120 = tpu.concatenate %99, %119 in 0 : vector<8x16xf32>, vector<8x16xf32> -> vector<16x16xf32>
    %c0_58 = arith.constant 0 : index
    %c3 = arith.constant 3 : index
    %c0_59 = arith.constant 0 : index
    %c0_60 = arith.constant 0 : index
    %c0_61 = arith.constant 0 : index
    %121 = vector.load %arg5[%c0_58, %c3, %c0_59, %c0_60, %c0_61] : memref<2x4x2x32x16xbf16, #tpu.memory_space<vmem>>, vector<1x1x1x32x16xbf16>
    %122 = vector.shape_cast %121 : vector<1x1x1x32x16xbf16> to vector<32x16xbf16>
    %123 = arith.truncf %120 : vector<16x16xf32> to vector<16x16xbf16>
    %cst_62 = arith.constant dense<0.000000e+00> : vector<16x32xf32>
    %124 = tpu.matmul %123, %122, %cst_62 {dimension_numbers = #tpu.dot_dimension_numbers<[1], [1], [0], [0], [0, 0, 1, 0], [], []>} : vector<16x16xbf16>, vector<32x16xbf16>, vector<16x32xf32> -> vector<16x32xf32>
    %125 = arith.addf %55, %124 : vector<16x32xf32>
    %c0_63 = arith.constant 0 : index
    %c0_64 = arith.constant 0 : index
    %c1_65 = arith.constant 1 : index
    %c0_66 = arith.constant 0 : index
    %c0_67 = arith.constant 0 : index
    %126 = vector.load %arg5[%c0_63, %c0_64, %c1_65, %c0_66, %c0_67] : memref<2x4x2x32x16xbf16, #tpu.memory_space<vmem>>, vector<1x1x1x32x16xbf16>
    %127 = vector.shape_cast %126 : vector<1x1x1x32x16xbf16> to vector<32x16xbf16>
    %128 = arith.truncf %49 : vector<16x32xf32> to vector<16x32xbf16>
    %cst_68 = arith.constant dense<0.000000e+00> : vector<16x16xf32>
    %129 = tpu.matmul %128, %127, %cst_68 {dimension_numbers = #tpu.dot_dimension_numbers<[1], [0], [0], [1], [0, 0, 1, 1], [], []>} : vector<16x32xbf16>, vector<32x16xbf16>, vector<16x16xf32> -> vector<16x16xf32>
    %c0_69 = arith.constant 0 : index
    %c0_70 = arith.constant 0 : index
    %c1_71 = arith.constant 1 : index
    %c0_72 = arith.constant 0 : index
    %c0_73 = arith.constant 0 : index
    %130 = vector.load %arg6[%c0_69, %c0_70, %c1_71, %c0_72, %c0_73] : memref<2x3x2x1x16xf32, #tpu.memory_space<vmem>>, vector<1x1x1x1x16xf32>
    %131 = vector.shape_cast %130 : vector<1x1x1x1x16xf32> to vector<1x16xf32>
    %132 = vector.broadcast %131 : vector<1x16xf32> to vector<16x16xf32>
    %133 = arith.addf %129, %132 : vector<16x16xf32>
    %c0_74 = arith.constant 0 : index
    %c1_75 = arith.constant 1 : index
    %c1_76 = arith.constant 1 : index
    %c0_77 = arith.constant 0 : index
    %c0_78 = arith.constant 0 : index
    %134 = vector.load %arg5[%c0_74, %c1_75, %c1_76, %c0_77, %c0_78] : memref<2x4x2x32x16xbf16, #tpu.memory_space<vmem>>, vector<1x1x1x32x16xbf16>
    %135 = vector.shape_cast %134 : vector<1x1x1x32x16xbf16> to vector<32x16xbf16>
    %136 = arith.truncf %49 : vector<16x32xf32> to vector<16x32xbf16>
    %cst_79 = arith.constant dense<0.000000e+00> : vector<16x16xf32>
    %137 = tpu.matmul %136, %135, %cst_79 {dimension_numbers = #tpu.dot_dimension_numbers<[1], [0], [0], [1], [0, 0, 1, 1], [], []>} : vector<16x32xbf16>, vector<32x16xbf16>, vector<16x16xf32> -> vector<16x16xf32>
    %c0_80 = arith.constant 0 : index
    %c1_81 = arith.constant 1 : index
    %c1_82 = arith.constant 1 : index
    %c0_83 = arith.constant 0 : index
    %c0_84 = arith.constant 0 : index
    %138 = vector.load %arg6[%c0_80, %c1_81, %c1_82, %c0_83, %c0_84] : memref<2x3x2x1x16xf32, #tpu.memory_space<vmem>>, vector<1x1x1x1x16xf32>
    %139 = vector.shape_cast %138 : vector<1x1x1x1x16xf32> to vector<1x16xf32>
    %140 = vector.broadcast %139 : vector<1x16xf32> to vector<16x16xf32>
    %141 = arith.addf %137, %140 : vector<16x16xf32>
    %c0_85 = arith.constant 0 : index
    %c2_86 = arith.constant 2 : index
    %c1_87 = arith.constant 1 : index
    %c0_88 = arith.constant 0 : index
    %c0_89 = arith.constant 0 : index
    %142 = vector.load %arg5[%c0_85, %c2_86, %c1_87, %c0_88, %c0_89] : memref<2x4x2x32x16xbf16, #tpu.memory_space<vmem>>, vector<1x1x1x32x16xbf16>
    %143 = vector.shape_cast %142 : vector<1x1x1x32x16xbf16> to vector<32x16xbf16>
    %144 = arith.truncf %49 : vector<16x32xf32> to vector<16x32xbf16>
    %cst_90 = arith.constant dense<0.000000e+00> : vector<16x16xf32>
    %145 = tpu.matmul %144, %143, %cst_90 {dimension_numbers = #tpu.dot_dimension_numbers<[1], [0], [0], [1], [0, 0, 1, 1], [], []>} : vector<16x32xbf16>, vector<32x16xbf16>, vector<16x16xf32> -> vector<16x16xf32>
    %c0_91 = arith.constant 0 : index
    %c2_92 = arith.constant 2 : index
    %c1_93 = arith.constant 1 : index
    %c0_94 = arith.constant 0 : index
    %c0_95 = arith.constant 0 : index
    %146 = vector.load %arg6[%c0_91, %c2_92, %c1_93, %c0_94, %c0_95] : memref<2x3x2x1x16xf32, #tpu.memory_space<vmem>>, vector<1x1x1x1x16xf32>
    %147 = vector.shape_cast %146 : vector<1x1x1x1x16xf32> to vector<1x16xf32>
    %148 = vector.broadcast %147 : vector<1x16xf32> to vector<16x16xf32>
    %149 = arith.addf %145, %148 : vector<16x16xf32>
    %150 = vector.extract_strided_slice %133 {offsets = [0, 0], sizes = [8, 16], strides = [1, 1]} : vector<16x16xf32> to vector<8x16xf32>
    %151 = vector.extract_strided_slice %141 {offsets = [0, 0], sizes = [8, 16], strides = [1, 1]} : vector<16x16xf32> to vector<8x16xf32>
    %cst_96 = arith.constant dense<0.000000e+00> : vector<8x8xf32>
    %152 = tpu.matmul %150, %151, %cst_96 {dimension_numbers = #tpu.dot_dimension_numbers<[1], [1], [0], [0], [0, 0, 1, 0], [], []>} : vector<8x16xf32>, vector<8x16xf32>, vector<8x8xf32> -> vector<8x8xf32>
    %153 = vector.extract_strided_slice %54 {offsets = [0, 0], sizes = [1, 8], strides = [1, 1]} : vector<2x8xf32> to vector<1x8xf32>
    %154 = vector.shape_cast %153 : vector<1x8xf32> to vector<8xf32>
    %155 = vector.shape_cast %154 : vector<8xf32> to vector<1x8xf32>
    %156 = vector.broadcast %155 : vector<1x8xf32> to vector<8x8xf32>
    %157 = arith.addf %152, %156 : vector<8x8xf32>
    %cst_97 = arith.constant dense<0xFF800000> : vector<8xf32>
    %158 = vector.multi_reduction <maximumf>, %157, %cst_97 [1] : vector<8x8xf32> to vector<8xf32>
    %159 = vector.shape_cast %158 : vector<8xf32> to vector<8x1xf32>
    %160 = vector.broadcast %159 : vector<8x1xf32> to vector<8x8xf32>
    %161 = arith.subf %157, %160 : vector<8x8xf32>
    %162 = math.exp %161 : vector<8x8xf32>
    %cst_98 = arith.constant dense<0.000000e+00> : vector<8xf32>
    %163 = vector.multi_reduction <add>, %162, %cst_98 [1] : vector<8x8xf32> to vector<8xf32>
    %164 = vector.shape_cast %163 : vector<8xf32> to vector<8x1xf32>
    %165 = tpu.reciprocal %164 {approx = true} : vector<8x1xf32> -> vector<8x1xf32>
    %166 = vector.broadcast %165 : vector<8x1xf32> to vector<8x8xf32>
    %167 = arith.mulf %162, %166 : vector<8x8xf32>
    %168 = vector.extract_strided_slice %149 {offsets = [0, 0], sizes = [8, 16], strides = [1, 1]} : vector<16x16xf32> to vector<8x16xf32>
    %cst_99 = arith.constant dense<0.000000e+00> : vector<8x16xf32>
    %169 = tpu.matmul %167, %168, %cst_99 {dimension_numbers = #tpu.dot_dimension_numbers<[1], [0], [0], [1], [0, 0, 1, 1], [], []>} : vector<8x8xf32>, vector<8x16xf32>, vector<8x16xf32> -> vector<8x16xf32>
    %170 = vector.extract_strided_slice %133 {offsets = [8, 0], sizes = [8, 16], strides = [1, 1]} : vector<16x16xf32> to vector<8x16xf32>
    %171 = vector.extract_strided_slice %141 {offsets = [8, 0], sizes = [8, 16], strides = [1, 1]} : vector<16x16xf32> to vector<8x16xf32>
    %cst_100 = arith.constant dense<0.000000e+00> : vector<8x8xf32>
    %172 = tpu.matmul %170, %171, %cst_100 {dimension_numbers = #tpu.dot_dimension_numbers<[1], [1], [0], [0], [0, 0, 1, 0], [], []>} : vector<8x16xf32>, vector<8x16xf32>, vector<8x8xf32> -> vector<8x8xf32>
    %173 = vector.extract_strided_slice %54 {offsets = [1, 0], sizes = [1, 8], strides = [1, 1]} : vector<2x8xf32> to vector<1x8xf32>
    %174 = vector.shape_cast %173 : vector<1x8xf32> to vector<8xf32>
    %175 = vector.shape_cast %174 : vector<8xf32> to vector<1x8xf32>
    %176 = vector.broadcast %175 : vector<1x8xf32> to vector<8x8xf32>
    %177 = arith.addf %172, %176 : vector<8x8xf32>
    %cst_101 = arith.constant dense<0xFF800000> : vector<8xf32>
    %178 = vector.multi_reduction <maximumf>, %177, %cst_101 [1] : vector<8x8xf32> to vector<8xf32>
    %179 = vector.shape_cast %178 : vector<8xf32> to vector<8x1xf32>
    %180 = vector.broadcast %179 : vector<8x1xf32> to vector<8x8xf32>
    %181 = arith.subf %177, %180 : vector<8x8xf32>
    %182 = math.exp %181 : vector<8x8xf32>
    %cst_102 = arith.constant dense<0.000000e+00> : vector<8xf32>
    %183 = vector.multi_reduction <add>, %182, %cst_102 [1] : vector<8x8xf32> to vector<8xf32>
    %184 = vector.shape_cast %183 : vector<8xf32> to vector<8x1xf32>
    %185 = tpu.reciprocal %184 {approx = true} : vector<8x1xf32> -> vector<8x1xf32>
    %186 = vector.broadcast %185 : vector<8x1xf32> to vector<8x8xf32>
    %187 = arith.mulf %182, %186 : vector<8x8xf32>
    %188 = vector.extract_strided_slice %149 {offsets = [8, 0], sizes = [8, 16], strides = [1, 1]} : vector<16x16xf32> to vector<8x16xf32>
    %cst_103 = arith.constant dense<0.000000e+00> : vector<8x16xf32>
    %189 = tpu.matmul %187, %188, %cst_103 {dimension_numbers = #tpu.dot_dimension_numbers<[1], [0], [0], [1], [0, 0, 1, 1], [], []>} : vector<8x8xf32>, vector<8x16xf32>, vector<8x16xf32> -> vector<8x16xf32>
    %190 = tpu.concatenate %169, %189 in 0 : vector<8x16xf32>, vector<8x16xf32> -> vector<16x16xf32>
    %c0_104 = arith.constant 0 : index
    %c3_105 = arith.constant 3 : index
    %c1_106 = arith.constant 1 : index
    %c0_107 = arith.constant 0 : index
    %c0_108 = arith.constant 0 : index
    %191 = vector.load %arg5[%c0_104, %c3_105, %c1_106, %c0_107, %c0_108] : memref<2x4x2x32x16xbf16, #tpu.memory_space<vmem>>, vector<1x1x1x32x16xbf16>
    %192 = vector.shape_cast %191 : vector<1x1x1x32x16xbf16> to vector<32x16xbf16>
    %193 = arith.truncf %190 : vector<16x16xf32> to vector<16x16xbf16>
    %cst_109 = arith.constant dense<0.000000e+00> : vector<16x32xf32>
    %194 = tpu.matmul %193, %192, %cst_109 {dimension_numbers = #tpu.dot_dimension_numbers<[1], [1], [0], [0], [0, 0, 1, 0], [], []>} : vector<16x16xbf16>, vector<32x16xbf16>, vector<16x32xf32> -> vector<16x32xf32>
    %195 = arith.addf %125, %194 : vector<16x32xf32>
    %196 = arith.addf %49, %195 : vector<16x32xf32>
    %c2_110 = arith.constant 2 : index
    %c0_111 = arith.constant 0 : index
    %197 = vector.load %arg9[%c2_110, %c0_111] : memref<15x32xf32, #tpu.memory_space<vmem>>, vector<1x32xf32>
    %198 = vector.shape_cast %197 : vector<1x32xf32> to vector<32xf32>
    %199 = vector.shape_cast %198 : vector<32xf32> to vector<1x32xf32>
    %200 = vector.broadcast %199 : vector<1x32xf32> to vector<16x32xf32>
    %201 = arith.addf %196, %200 : vector<16x32xf32>
    %c3_112 = arith.constant 3 : index
    %c0_113 = arith.constant 0 : index
    %202 = vector.load %arg9[%c3_112, %c0_113] : memref<15x32xf32, #tpu.memory_space<vmem>>, vector<1x32xf32>
    %203 = vector.shape_cast %202 : vector<1x32xf32> to vector<32xf32>
    %c4 = arith.constant 4 : index
    %c0_114 = arith.constant 0 : index
    %204 = vector.load %arg9[%c4, %c0_114] : memref<15x32xf32, #tpu.memory_space<vmem>>, vector<1x32xf32>
    %205 = vector.shape_cast %204 : vector<1x32xf32> to vector<32xf32>
    %cst_115 = arith.constant dense<0.000000e+00> : vector<16xf32>
    %206 = vector.multi_reduction <add>, %201, %cst_115 [1] : vector<16x32xf32> to vector<16xf32>
    %207 = vector.shape_cast %206 : vector<16xf32> to vector<16x1xf32>
    %cst_116 = arith.constant 3.200000e+01 : f32
    %208 = vector.broadcast %cst_116 : f32 to vector<16x1xf32>
    %209 = arith.divf %207, %208 : vector<16x1xf32>
    %210 = vector.broadcast %209 : vector<16x1xf32> to vector<16x32xf32>
    %211 = arith.subf %201, %210 : vector<16x32xf32>
    %212 = arith.mulf %211, %211 : vector<16x32xf32>
    %cst_117 = arith.constant dense<0.000000e+00> : vector<16xf32>
    %213 = vector.multi_reduction <add>, %212, %cst_117 [1] : vector<16x32xf32> to vector<16xf32>
    %214 = vector.shape_cast %213 : vector<16xf32> to vector<16x1xf32>
    %cst_118 = arith.constant 3.200000e+01 : f32
    %215 = vector.broadcast %cst_118 : f32 to vector<16x1xf32>
    %216 = arith.divf %214, %215 : vector<16x1xf32>
    %217 = vector.broadcast %209 : vector<16x1xf32> to vector<16x32xf32>
    %218 = arith.subf %201, %217 : vector<16x32xf32>
    %cst_119 = arith.constant 9.99999996E-13 : f32
    %219 = vector.broadcast %cst_119 : f32 to vector<16x1xf32>
    %220 = arith.addf %216, %219 : vector<16x1xf32>
    %221 = math.rsqrt %220 : vector<16x1xf32>
    %222 = vector.broadcast %221 : vector<16x1xf32> to vector<16x32xf32>
    %223 = arith.mulf %218, %222 : vector<16x32xf32>
    %224 = vector.shape_cast %203 : vector<32xf32> to vector<1x32xf32>
    %225 = vector.broadcast %224 : vector<1x32xf32> to vector<16x32xf32>
    %226 = arith.mulf %223, %225 : vector<16x32xf32>
    %227 = vector.shape_cast %205 : vector<32xf32> to vector<1x32xf32>
    %228 = vector.broadcast %227 : vector<1x32xf32> to vector<16x32xf32>
    %229 = arith.addf %226, %228 : vector<16x32xf32>
    %c0_120 = arith.constant 0 : index
    %c0_121 = arith.constant 0 : index
    %c0_122 = arith.constant 0 : index
    %c0_123 = arith.constant 0 : index
    %230 = vector.load %arg7[%c0_120, %c0_121, %c0_122, %c0_123] : memref<2x2x32x64xbf16, #tpu.memory_space<vmem>>, vector<1x1x32x64xbf16>
    %231 = vector.shape_cast %230 : vector<1x1x32x64xbf16> to vector<32x64xbf16>
    %232 = arith.truncf %229 : vector<16x32xf32> to vector<16x32xbf16>
    %cst_124 = arith.constant dense<0.000000e+00> : vector<16x64xf32>
    %233 = tpu.matmul %232, %231, %cst_124 {dimension_numbers = #tpu.dot_dimension_numbers<[1], [0], [0], [1], [0, 0, 1, 1], [], []>} : vector<16x32xbf16>, vector<32x64xbf16>, vector<16x64xf32> -> vector<16x64xf32>
    %c0_125 = arith.constant 0 : index
    %c0_126 = arith.constant 0 : index
    %c0_127 = arith.constant 0 : index
    %234 = vector.load %arg8[%c0_125, %c0_126, %c0_127] : memref<2x1x64xf32, #tpu.memory_space<vmem>>, vector<1x1x64xf32>
    %235 = vector.shape_cast %234 : vector<1x1x64xf32> to vector<64xf32>
    %236 = vector.shape_cast %235 : vector<64xf32> to vector<1x64xf32>
    %237 = vector.broadcast %236 : vector<1x64xf32> to vector<16x64xf32>
    %238 = arith.addf %233, %237 : vector<16x64xf32>
    %239 = arith.mulf %238, %238 : vector<16x64xf32>
    %240 = arith.mulf %238, %239 : vector<16x64xf32>
    %cst_128 = arith.constant 4.471500e-02 : f32
    %241 = vector.broadcast %cst_128 : f32 to vector<16x64xf32>
    %242 = arith.mulf %241, %240 : vector<16x64xf32>
    %243 = arith.addf %238, %242 : vector<16x64xf32>
    %cst_129 = arith.constant 0.797884583 : f32
    %244 = vector.broadcast %cst_129 : f32 to vector<16x64xf32>
    %245 = arith.mulf %244, %243 : vector<16x64xf32>
    %246 = math.tanh %245 : vector<16x64xf32>
    %cst_130 = arith.constant 1.000000e+00 : f32
    %247 = vector.broadcast %cst_130 : f32 to vector<16x64xf32>
    %248 = arith.addf %247, %246 : vector<16x64xf32>
    %cst_131 = arith.constant 5.000000e-01 : f32
    %249 = vector.broadcast %cst_131 : f32 to vector<16x64xf32>
    %250 = arith.mulf %249, %248 : vector<16x64xf32>
    %251 = arith.mulf %238, %250 : vector<16x64xf32>
    %c0_132 = arith.constant 0 : index
    %c1_133 = arith.constant 1 : index
    %c0_134 = arith.constant 0 : index
    %c0_135 = arith.constant 0 : index
    %252 = vector.load %arg7[%c0_132, %c1_133, %c0_134, %c0_135] : memref<2x2x32x64xbf16, #tpu.memory_space<vmem>>, vector<1x1x32x64xbf16>
    %253 = vector.shape_cast %252 : vector<1x1x32x64xbf16> to vector<32x64xbf16>
    %254 = arith.truncf %251 : vector<16x64xf32> to vector<16x64xbf16>
    %cst_136 = arith.constant dense<0.000000e+00> : vector<16x32xf32>
    %255 = tpu.matmul %254, %253, %cst_136 {dimension_numbers = #tpu.dot_dimension_numbers<[1], [1], [0], [0], [0, 0, 1, 0], [], []>} : vector<16x64xbf16>, vector<32x64xbf16>, vector<16x32xf32> -> vector<16x32xf32>
    %c5 = arith.constant 5 : index
    %c0_137 = arith.constant 0 : index
    %256 = vector.load %arg9[%c5, %c0_137] : memref<15x32xf32, #tpu.memory_space<vmem>>, vector<1x32xf32>
    %257 = vector.shape_cast %256 : vector<1x32xf32> to vector<32xf32>
    %258 = vector.shape_cast %257 : vector<32xf32> to vector<1x32xf32>
    %259 = vector.broadcast %258 : vector<1x32xf32> to vector<16x32xf32>
    %260 = arith.addf %255, %259 : vector<16x32xf32>
    %261 = arith.addf %229, %260 : vector<16x32xf32>
    %c6 = arith.constant 6 : index
    %c0_138 = arith.constant 0 : index
    %262 = vector.load %arg9[%c6, %c0_138] : memref<15x32xf32, #tpu.memory_space<vmem>>, vector<1x32xf32>
    %263 = vector.shape_cast %262 : vector<1x32xf32> to vector<32xf32>
    %c7 = arith.constant 7 : index
    %c0_139 = arith.constant 0 : index
    %264 = vector.load %arg9[%c7, %c0_139] : memref<15x32xf32, #tpu.memory_space<vmem>>, vector<1x32xf32>
    %265 = vector.shape_cast %264 : vector<1x32xf32> to vector<32xf32>
    %cst_140 = arith.constant dense<0.000000e+00> : vector<16xf32>
    %266 = vector.multi_reduction <add>, %261, %cst_140 [1] : vector<16x32xf32> to vector<16xf32>
    %267 = vector.shape_cast %266 : vector<16xf32> to vector<16x1xf32>
    %cst_141 = arith.constant 3.200000e+01 : f32
    %268 = vector.broadcast %cst_141 : f32 to vector<16x1xf32>
    %269 = arith.divf %267, %268 : vector<16x1xf32>
    %270 = vector.broadcast %269 : vector<16x1xf32> to vector<16x32xf32>
    %271 = arith.subf %261, %270 : vector<16x32xf32>
    %272 = arith.mulf %271, %271 : vector<16x32xf32>
    %cst_142 = arith.constant dense<0.000000e+00> : vector<16xf32>
    %273 = vector.multi_reduction <add>, %272, %cst_142 [1] : vector<16x32xf32> to vector<16xf32>
    %274 = vector.shape_cast %273 : vector<16xf32> to vector<16x1xf32>
    %cst_143 = arith.constant 3.200000e+01 : f32
    %275 = vector.broadcast %cst_143 : f32 to vector<16x1xf32>
    %276 = arith.divf %274, %275 : vector<16x1xf32>
    %277 = vector.broadcast %269 : vector<16x1xf32> to vector<16x32xf32>
    %278 = arith.subf %261, %277 : vector<16x32xf32>
    %cst_144 = arith.constant 9.99999996E-13 : f32
    %279 = vector.broadcast %cst_144 : f32 to vector<16x1xf32>
    %280 = arith.addf %276, %279 : vector<16x1xf32>
    %281 = math.rsqrt %280 : vector<16x1xf32>
    %282 = vector.broadcast %281 : vector<16x1xf32> to vector<16x32xf32>
    %283 = arith.mulf %278, %282 : vector<16x32xf32>
    %284 = vector.shape_cast %263 : vector<32xf32> to vector<1x32xf32>
    %285 = vector.broadcast %284 : vector<1x32xf32> to vector<16x32xf32>
    %286 = arith.mulf %283, %285 : vector<16x32xf32>
    %287 = vector.shape_cast %265 : vector<32xf32> to vector<1x32xf32>
    %288 = vector.broadcast %287 : vector<1x32xf32> to vector<16x32xf32>
    %289 = arith.addf %286, %288 : vector<16x32xf32>
    %cst_145 = arith.constant 0.000000e+00 : f32
    %290 = vector.broadcast %cst_145 : f32 to vector<16x32xf32>
    %c1_146 = arith.constant 1 : index
    %c0_147 = arith.constant 0 : index
    %c0_148 = arith.constant 0 : index
    %c0_149 = arith.constant 0 : index
    %c0_150 = arith.constant 0 : index
    %291 = vector.load %arg5[%c1_146, %c0_147, %c0_148, %c0_149, %c0_150] : memref<2x4x2x32x16xbf16, #tpu.memory_space<vmem>>, vector<1x1x1x32x16xbf16>
    %292 = vector.shape_cast %291 : vector<1x1x1x32x16xbf16> to vector<32x16xbf16>
    %293 = arith.truncf %289 : vector<16x32xf32> to vector<16x32xbf16>
    %cst_151 = arith.constant dense<0.000000e+00> : vector<16x16xf32>
    %294 = tpu.matmul %293, %292, %cst_151 {dimension_numbers = #tpu.dot_dimension_numbers<[1], [0], [0], [1], [0, 0, 1, 1], [], []>} : vector<16x32xbf16>, vector<32x16xbf16>, vector<16x16xf32> -> vector<16x16xf32>
    %c1_152 = arith.constant 1 : index
    %c0_153 = arith.constant 0 : index
    %c0_154 = arith.constant 0 : index
    %c0_155 = arith.constant 0 : index
    %c0_156 = arith.constant 0 : index
    %295 = vector.load %arg6[%c1_152, %c0_153, %c0_154, %c0_155, %c0_156] : memref<2x3x2x1x16xf32, #tpu.memory_space<vmem>>, vector<1x1x1x1x16xf32>
    %296 = vector.shape_cast %295 : vector<1x1x1x1x16xf32> to vector<1x16xf32>
    %297 = vector.broadcast %296 : vector<1x16xf32> to vector<16x16xf32>
    %298 = arith.addf %294, %297 : vector<16x16xf32>
    %c1_157 = arith.constant 1 : index
    %c1_158 = arith.constant 1 : index
    %c0_159 = arith.constant 0 : index
    %c0_160 = arith.constant 0 : index
    %c0_161 = arith.constant 0 : index
    %299 = vector.load %arg5[%c1_157, %c1_158, %c0_159, %c0_160, %c0_161] : memref<2x4x2x32x16xbf16, #tpu.memory_space<vmem>>, vector<1x1x1x32x16xbf16>
    %300 = vector.shape_cast %299 : vector<1x1x1x32x16xbf16> to vector<32x16xbf16>
    %301 = arith.truncf %289 : vector<16x32xf32> to vector<16x32xbf16>
    %cst_162 = arith.constant dense<0.000000e+00> : vector<16x16xf32>
    %302 = tpu.matmul %301, %300, %cst_162 {dimension_numbers = #tpu.dot_dimension_numbers<[1], [0], [0], [1], [0, 0, 1, 1], [], []>} : vector<16x32xbf16>, vector<32x16xbf16>, vector<16x16xf32> -> vector<16x16xf32>
    %c1_163 = arith.constant 1 : index
    %c1_164 = arith.constant 1 : index
    %c0_165 = arith.constant 0 : index
    %c0_166 = arith.constant 0 : index
    %c0_167 = arith.constant 0 : index
    %303 = vector.load %arg6[%c1_163, %c1_164, %c0_165, %c0_166, %c0_167] : memref<2x3x2x1x16xf32, #tpu.memory_space<vmem>>, vector<1x1x1x1x16xf32>
    %304 = vector.shape_cast %303 : vector<1x1x1x1x16xf32> to vector<1x16xf32>
    %305 = vector.broadcast %304 : vector<1x16xf32> to vector<16x16xf32>
    %306 = arith.addf %302, %305 : vector<16x16xf32>
    %c1_168 = arith.constant 1 : index
    %c2_169 = arith.constant 2 : index
    %c0_170 = arith.constant 0 : index
    %c0_171 = arith.constant 0 : index
    %c0_172 = arith.constant 0 : index
    %307 = vector.load %arg5[%c1_168, %c2_169, %c0_170, %c0_171, %c0_172] : memref<2x4x2x32x16xbf16, #tpu.memory_space<vmem>>, vector<1x1x1x32x16xbf16>
    %308 = vector.shape_cast %307 : vector<1x1x1x32x16xbf16> to vector<32x16xbf16>
    %309 = arith.truncf %289 : vector<16x32xf32> to vector<16x32xbf16>
    %cst_173 = arith.constant dense<0.000000e+00> : vector<16x16xf32>
    %310 = tpu.matmul %309, %308, %cst_173 {dimension_numbers = #tpu.dot_dimension_numbers<[1], [0], [0], [1], [0, 0, 1, 1], [], []>} : vector<16x32xbf16>, vector<32x16xbf16>, vector<16x16xf32> -> vector<16x16xf32>
    %c1_174 = arith.constant 1 : index
    %c2_175 = arith.constant 2 : index
    %c0_176 = arith.constant 0 : index
    %c0_177 = arith.constant 0 : index
    %c0_178 = arith.constant 0 : index
    %311 = vector.load %arg6[%c1_174, %c2_175, %c0_176, %c0_177, %c0_178] : memref<2x3x2x1x16xf32, #tpu.memory_space<vmem>>, vector<1x1x1x1x16xf32>
    %312 = vector.shape_cast %311 : vector<1x1x1x1x16xf32> to vector<1x16xf32>
    %313 = vector.broadcast %312 : vector<1x16xf32> to vector<16x16xf32>
    %314 = arith.addf %310, %313 : vector<16x16xf32>
    %315 = vector.extract_strided_slice %298 {offsets = [0, 0], sizes = [8, 16], strides = [1, 1]} : vector<16x16xf32> to vector<8x16xf32>
    %316 = vector.extract_strided_slice %306 {offsets = [0, 0], sizes = [8, 16], strides = [1, 1]} : vector<16x16xf32> to vector<8x16xf32>
    %cst_179 = arith.constant dense<0.000000e+00> : vector<8x8xf32>
    %317 = tpu.matmul %315, %316, %cst_179 {dimension_numbers = #tpu.dot_dimension_numbers<[1], [1], [0], [0], [0, 0, 1, 0], [], []>} : vector<8x16xf32>, vector<8x16xf32>, vector<8x8xf32> -> vector<8x8xf32>
    %318 = vector.extract_strided_slice %54 {offsets = [0, 0], sizes = [1, 8], strides = [1, 1]} : vector<2x8xf32> to vector<1x8xf32>
    %319 = vector.shape_cast %318 : vector<1x8xf32> to vector<8xf32>
    %320 = vector.shape_cast %319 : vector<8xf32> to vector<1x8xf32>
    %321 = vector.broadcast %320 : vector<1x8xf32> to vector<8x8xf32>
    %322 = arith.addf %317, %321 : vector<8x8xf32>
    %cst_180 = arith.constant dense<0xFF800000> : vector<8xf32>
    %323 = vector.multi_reduction <maximumf>, %322, %cst_180 [1] : vector<8x8xf32> to vector<8xf32>
    %324 = vector.shape_cast %323 : vector<8xf32> to vector<8x1xf32>
    %325 = vector.broadcast %324 : vector<8x1xf32> to vector<8x8xf32>
    %326 = arith.subf %322, %325 : vector<8x8xf32>
    %327 = math.exp %326 : vector<8x8xf32>
    %cst_181 = arith.constant dense<0.000000e+00> : vector<8xf32>
    %328 = vector.multi_reduction <add>, %327, %cst_181 [1] : vector<8x8xf32> to vector<8xf32>
    %329 = vector.shape_cast %328 : vector<8xf32> to vector<8x1xf32>
    %330 = tpu.reciprocal %329 {approx = true} : vector<8x1xf32> -> vector<8x1xf32>
    %331 = vector.broadcast %330 : vector<8x1xf32> to vector<8x8xf32>
    %332 = arith.mulf %327, %331 : vector<8x8xf32>
    %333 = vector.extract_strided_slice %314 {offsets = [0, 0], sizes = [8, 16], strides = [1, 1]} : vector<16x16xf32> to vector<8x16xf32>
    %cst_182 = arith.constant dense<0.000000e+00> : vector<8x16xf32>
    %334 = tpu.matmul %332, %333, %cst_182 {dimension_numbers = #tpu.dot_dimension_numbers<[1], [0], [0], [1], [0, 0, 1, 1], [], []>} : vector<8x8xf32>, vector<8x16xf32>, vector<8x16xf32> -> vector<8x16xf32>
    %335 = vector.extract_strided_slice %298 {offsets = [8, 0], sizes = [8, 16], strides = [1, 1]} : vector<16x16xf32> to vector<8x16xf32>
    %336 = vector.extract_strided_slice %306 {offsets = [8, 0], sizes = [8, 16], strides = [1, 1]} : vector<16x16xf32> to vector<8x16xf32>
    %cst_183 = arith.constant dense<0.000000e+00> : vector<8x8xf32>
    %337 = tpu.matmul %335, %336, %cst_183 {dimension_numbers = #tpu.dot_dimension_numbers<[1], [1], [0], [0], [0, 0, 1, 0], [], []>} : vector<8x16xf32>, vector<8x16xf32>, vector<8x8xf32> -> vector<8x8xf32>
    %338 = vector.extract_strided_slice %54 {offsets = [1, 0], sizes = [1, 8], strides = [1, 1]} : vector<2x8xf32> to vector<1x8xf32>
    %339 = vector.shape_cast %338 : vector<1x8xf32> to vector<8xf32>
    %340 = vector.shape_cast %339 : vector<8xf32> to vector<1x8xf32>
    %341 = vector.broadcast %340 : vector<1x8xf32> to vector<8x8xf32>
    %342 = arith.addf %337, %341 : vector<8x8xf32>
    %cst_184 = arith.constant dense<0xFF800000> : vector<8xf32>
    %343 = vector.multi_reduction <maximumf>, %342, %cst_184 [1] : vector<8x8xf32> to vector<8xf32>
    %344 = vector.shape_cast %343 : vector<8xf32> to vector<8x1xf32>
    %345 = vector.broadcast %344 : vector<8x1xf32> to vector<8x8xf32>
    %346 = arith.subf %342, %345 : vector<8x8xf32>
    %347 = math.exp %346 : vector<8x8xf32>
    %cst_185 = arith.constant dense<0.000000e+00> : vector<8xf32>
    %348 = vector.multi_reduction <add>, %347, %cst_185 [1] : vector<8x8xf32> to vector<8xf32>
    %349 = vector.shape_cast %348 : vector<8xf32> to vector<8x1xf32>
    %350 = tpu.reciprocal %349 {approx = true} : vector<8x1xf32> -> vector<8x1xf32>
    %351 = vector.broadcast %350 : vector<8x1xf32> to vector<8x8xf32>
    %352 = arith.mulf %347, %351 : vector<8x8xf32>
    %353 = vector.extract_strided_slice %314 {offsets = [8, 0], sizes = [8, 16], strides = [1, 1]} : vector<16x16xf32> to vector<8x16xf32>
    %cst_186 = arith.constant dense<0.000000e+00> : vector<8x16xf32>
    %354 = tpu.matmul %352, %353, %cst_186 {dimension_numbers = #tpu.dot_dimension_numbers<[1], [0], [0], [1], [0, 0, 1, 1], [], []>} : vector<8x8xf32>, vector<8x16xf32>, vector<8x16xf32> -> vector<8x16xf32>
    %355 = tpu.concatenate %334, %354 in 0 : vector<8x16xf32>, vector<8x16xf32> -> vector<16x16xf32>
    %c1_187 = arith.constant 1 : index
    %c3_188 = arith.constant 3 : index
    %c0_189 = arith.constant 0 : index
    %c0_190 = arith.constant 0 : index
    %c0_191 = arith.constant 0 : index
    %356 = vector.load %arg5[%c1_187, %c3_188, %c0_189, %c0_190, %c0_191] : memref<2x4x2x32x16xbf16, #tpu.memory_space<vmem>>, vector<1x1x1x32x16xbf16>
    %357 = vector.shape_cast %356 : vector<1x1x1x32x16xbf16> to vector<32x16xbf16>
    %358 = arith.truncf %355 : vector<16x16xf32> to vector<16x16xbf16>
    %cst_192 = arith.constant dense<0.000000e+00> : vector<16x32xf32>
    %359 = tpu.matmul %358, %357, %cst_192 {dimension_numbers = #tpu.dot_dimension_numbers<[1], [1], [0], [0], [0, 0, 1, 0], [], []>} : vector<16x16xbf16>, vector<32x16xbf16>, vector<16x32xf32> -> vector<16x32xf32>
    %360 = arith.addf %290, %359 : vector<16x32xf32>
    %c1_193 = arith.constant 1 : index
    %c0_194 = arith.constant 0 : index
    %c1_195 = arith.constant 1 : index
    %c0_196 = arith.constant 0 : index
    %c0_197 = arith.constant 0 : index
    %361 = vector.load %arg5[%c1_193, %c0_194, %c1_195, %c0_196, %c0_197] : memref<2x4x2x32x16xbf16, #tpu.memory_space<vmem>>, vector<1x1x1x32x16xbf16>
    %362 = vector.shape_cast %361 : vector<1x1x1x32x16xbf16> to vector<32x16xbf16>
    %363 = arith.truncf %289 : vector<16x32xf32> to vector<16x32xbf16>
    %cst_198 = arith.constant dense<0.000000e+00> : vector<16x16xf32>
    %364 = tpu.matmul %363, %362, %cst_198 {dimension_numbers = #tpu.dot_dimension_numbers<[1], [0], [0], [1], [0, 0, 1, 1], [], []>} : vector<16x32xbf16>, vector<32x16xbf16>, vector<16x16xf32> -> vector<16x16xf32>
    %c1_199 = arith.constant 1 : index
    %c0_200 = arith.constant 0 : index
    %c1_201 = arith.constant 1 : index
    %c0_202 = arith.constant 0 : index
    %c0_203 = arith.constant 0 : index
    %365 = vector.load %arg6[%c1_199, %c0_200, %c1_201, %c0_202, %c0_203] : memref<2x3x2x1x16xf32, #tpu.memory_space<vmem>>, vector<1x1x1x1x16xf32>
    %366 = vector.shape_cast %365 : vector<1x1x1x1x16xf32> to vector<1x16xf32>
    %367 = vector.broadcast %366 : vector<1x16xf32> to vector<16x16xf32>
    %368 = arith.addf %364, %367 : vector<16x16xf32>
    %c1_204 = arith.constant 1 : index
    %c1_205 = arith.constant 1 : index
    %c1_206 = arith.constant 1 : index
    %c0_207 = arith.constant 0 : index
    %c0_208 = arith.constant 0 : index
    %369 = vector.load %arg5[%c1_204, %c1_205, %c1_206, %c0_207, %c0_208] : memref<2x4x2x32x16xbf16, #tpu.memory_space<vmem>>, vector<1x1x1x32x16xbf16>
    %370 = vector.shape_cast %369 : vector<1x1x1x32x16xbf16> to vector<32x16xbf16>
    %371 = arith.truncf %289 : vector<16x32xf32> to vector<16x32xbf16>
    %cst_209 = arith.constant dense<0.000000e+00> : vector<16x16xf32>
    %372 = tpu.matmul %371, %370, %cst_209 {dimension_numbers = #tpu.dot_dimension_numbers<[1], [0], [0], [1], [0, 0, 1, 1], [], []>} : vector<16x32xbf16>, vector<32x16xbf16>, vector<16x16xf32> -> vector<16x16xf32>
    %c1_210 = arith.constant 1 : index
    %c1_211 = arith.constant 1 : index
    %c1_212 = arith.constant 1 : index
    %c0_213 = arith.constant 0 : index
    %c0_214 = arith.constant 0 : index
    %373 = vector.load %arg6[%c1_210, %c1_211, %c1_212, %c0_213, %c0_214] : memref<2x3x2x1x16xf32, #tpu.memory_space<vmem>>, vector<1x1x1x1x16xf32>
    %374 = vector.shape_cast %373 : vector<1x1x1x1x16xf32> to vector<1x16xf32>
    %375 = vector.broadcast %374 : vector<1x16xf32> to vector<16x16xf32>
    %376 = arith.addf %372, %375 : vector<16x16xf32>
    %c1_215 = arith.constant 1 : index
    %c2_216 = arith.constant 2 : index
    %c1_217 = arith.constant 1 : index
    %c0_218 = arith.constant 0 : index
    %c0_219 = arith.constant 0 : index
    %377 = vector.load %arg5[%c1_215, %c2_216, %c1_217, %c0_218, %c0_219] : memref<2x4x2x32x16xbf16, #tpu.memory_space<vmem>>, vector<1x1x1x32x16xbf16>
    %378 = vector.shape_cast %377 : vector<1x1x1x32x16xbf16> to vector<32x16xbf16>
    %379 = arith.truncf %289 : vector<16x32xf32> to vector<16x32xbf16>
    %cst_220 = arith.constant dense<0.000000e+00> : vector<16x16xf32>
    %380 = tpu.matmul %379, %378, %cst_220 {dimension_numbers = #tpu.dot_dimension_numbers<[1], [0], [0], [1], [0, 0, 1, 1], [], []>} : vector<16x32xbf16>, vector<32x16xbf16>, vector<16x16xf32> -> vector<16x16xf32>
    %c1_221 = arith.constant 1 : index
    %c2_222 = arith.constant 2 : index
    %c1_223 = arith.constant 1 : index
    %c0_224 = arith.constant 0 : index
    %c0_225 = arith.constant 0 : index
    %381 = vector.load %arg6[%c1_221, %c2_222, %c1_223, %c0_224, %c0_225] : memref<2x3x2x1x16xf32, #tpu.memory_space<vmem>>, vector<1x1x1x1x16xf32>
    %382 = vector.shape_cast %381 : vector<1x1x1x1x16xf32> to vector<1x16xf32>
    %383 = vector.broadcast %382 : vector<1x16xf32> to vector<16x16xf32>
    %384 = arith.addf %380, %383 : vector<16x16xf32>
    %385 = vector.extract_strided_slice %368 {offsets = [0, 0], sizes = [8, 16], strides = [1, 1]} : vector<16x16xf32> to vector<8x16xf32>
    %386 = vector.extract_strided_slice %376 {offsets = [0, 0], sizes = [8, 16], strides = [1, 1]} : vector<16x16xf32> to vector<8x16xf32>
    %cst_226 = arith.constant dense<0.000000e+00> : vector<8x8xf32>
    %387 = tpu.matmul %385, %386, %cst_226 {dimension_numbers = #tpu.dot_dimension_numbers<[1], [1], [0], [0], [0, 0, 1, 0], [], []>} : vector<8x16xf32>, vector<8x16xf32>, vector<8x8xf32> -> vector<8x8xf32>
    %388 = vector.extract_strided_slice %54 {offsets = [0, 0], sizes = [1, 8], strides = [1, 1]} : vector<2x8xf32> to vector<1x8xf32>
    %389 = vector.shape_cast %388 : vector<1x8xf32> to vector<8xf32>
    %390 = vector.shape_cast %389 : vector<8xf32> to vector<1x8xf32>
    %391 = vector.broadcast %390 : vector<1x8xf32> to vector<8x8xf32>
    %392 = arith.addf %387, %391 : vector<8x8xf32>
    %cst_227 = arith.constant dense<0xFF800000> : vector<8xf32>
    %393 = vector.multi_reduction <maximumf>, %392, %cst_227 [1] : vector<8x8xf32> to vector<8xf32>
    %394 = vector.shape_cast %393 : vector<8xf32> to vector<8x1xf32>
    %395 = vector.broadcast %394 : vector<8x1xf32> to vector<8x8xf32>
    %396 = arith.subf %392, %395 : vector<8x8xf32>
    %397 = math.exp %396 : vector<8x8xf32>
    %cst_228 = arith.constant dense<0.000000e+00> : vector<8xf32>
    %398 = vector.multi_reduction <add>, %397, %cst_228 [1] : vector<8x8xf32> to vector<8xf32>
    %399 = vector.shape_cast %398 : vector<8xf32> to vector<8x1xf32>
    %400 = tpu.reciprocal %399 {approx = true} : vector<8x1xf32> -> vector<8x1xf32>
    %401 = vector.broadcast %400 : vector<8x1xf32> to vector<8x8xf32>
    %402 = arith.mulf %397, %401 : vector<8x8xf32>
    %403 = vector.extract_strided_slice %384 {offsets = [0, 0], sizes = [8, 16], strides = [1, 1]} : vector<16x16xf32> to vector<8x16xf32>
    %cst_229 = arith.constant dense<0.000000e+00> : vector<8x16xf32>
    %404 = tpu.matmul %402, %403, %cst_229 {dimension_numbers = #tpu.dot_dimension_numbers<[1], [0], [0], [1], [0, 0, 1, 1], [], []>} : vector<8x8xf32>, vector<8x16xf32>, vector<8x16xf32> -> vector<8x16xf32>
    %405 = vector.extract_strided_slice %368 {offsets = [8, 0], sizes = [8, 16], strides = [1, 1]} : vector<16x16xf32> to vector<8x16xf32>
    %406 = vector.extract_strided_slice %376 {offsets = [8, 0], sizes = [8, 16], strides = [1, 1]} : vector<16x16xf32> to vector<8x16xf32>
    %cst_230 = arith.constant dense<0.000000e+00> : vector<8x8xf32>
    %407 = tpu.matmul %405, %406, %cst_230 {dimension_numbers = #tpu.dot_dimension_numbers<[1], [1], [0], [0], [0, 0, 1, 0], [], []>} : vector<8x16xf32>, vector<8x16xf32>, vector<8x8xf32> -> vector<8x8xf32>
    %408 = vector.extract_strided_slice %54 {offsets = [1, 0], sizes = [1, 8], strides = [1, 1]} : vector<2x8xf32> to vector<1x8xf32>
    %409 = vector.shape_cast %408 : vector<1x8xf32> to vector<8xf32>
    %410 = vector.shape_cast %409 : vector<8xf32> to vector<1x8xf32>
    %411 = vector.broadcast %410 : vector<1x8xf32> to vector<8x8xf32>
    %412 = arith.addf %407, %411 : vector<8x8xf32>
    %cst_231 = arith.constant dense<0xFF800000> : vector<8xf32>
    %413 = vector.multi_reduction <maximumf>, %412, %cst_231 [1] : vector<8x8xf32> to vector<8xf32>
    %414 = vector.shape_cast %413 : vector<8xf32> to vector<8x1xf32>
    %415 = vector.broadcast %414 : vector<8x1xf32> to vector<8x8xf32>
    %416 = arith.subf %412, %415 : vector<8x8xf32>
    %417 = math.exp %416 : vector<8x8xf32>
    %cst_232 = arith.constant dense<0.000000e+00> : vector<8xf32>
    %418 = vector.multi_reduction <add>, %417, %cst_232 [1] : vector<8x8xf32> to vector<8xf32>
    %419 = vector.shape_cast %418 : vector<8xf32> to vector<8x1xf32>
    %420 = tpu.reciprocal %419 {approx = true} : vector<8x1xf32> -> vector<8x1xf32>
    %421 = vector.broadcast %420 : vector<8x1xf32> to vector<8x8xf32>
    %422 = arith.mulf %417, %421 : vector<8x8xf32>
    %423 = vector.extract_strided_slice %384 {offsets = [8, 0], sizes = [8, 16], strides = [1, 1]} : vector<16x16xf32> to vector<8x16xf32>
    %cst_233 = arith.constant dense<0.000000e+00> : vector<8x16xf32>
    %424 = tpu.matmul %422, %423, %cst_233 {dimension_numbers = #tpu.dot_dimension_numbers<[1], [0], [0], [1], [0, 0, 1, 1], [], []>} : vector<8x8xf32>, vector<8x16xf32>, vector<8x16xf32> -> vector<8x16xf32>
    %425 = tpu.concatenate %404, %424 in 0 : vector<8x16xf32>, vector<8x16xf32> -> vector<16x16xf32>
    %c1_234 = arith.constant 1 : index
    %c3_235 = arith.constant 3 : index
    %c1_236 = arith.constant 1 : index
    %c0_237 = arith.constant 0 : index
    %c0_238 = arith.constant 0 : index
    %426 = vector.load %arg5[%c1_234, %c3_235, %c1_236, %c0_237, %c0_238] : memref<2x4x2x32x16xbf16, #tpu.memory_space<vmem>>, vector<1x1x1x32x16xbf16>
    %427 = vector.shape_cast %426 : vector<1x1x1x32x16xbf16> to vector<32x16xbf16>
    %428 = arith.truncf %425 : vector<16x16xf32> to vector<16x16xbf16>
    %cst_239 = arith.constant dense<0.000000e+00> : vector<16x32xf32>
    %429 = tpu.matmul %428, %427, %cst_239 {dimension_numbers = #tpu.dot_dimension_numbers<[1], [1], [0], [0], [0, 0, 1, 0], [], []>} : vector<16x16xbf16>, vector<32x16xbf16>, vector<16x32xf32> -> vector<16x32xf32>
    %430 = arith.addf %360, %429 : vector<16x32xf32>
    %431 = arith.addf %289, %430 : vector<16x32xf32>
    %c8 = arith.constant 8 : index
    %c0_240 = arith.constant 0 : index
    %432 = vector.load %arg9[%c8, %c0_240] : memref<15x32xf32, #tpu.memory_space<vmem>>, vector<1x32xf32>
    %433 = vector.shape_cast %432 : vector<1x32xf32> to vector<32xf32>
    %434 = vector.shape_cast %433 : vector<32xf32> to vector<1x32xf32>
    %435 = vector.broadcast %434 : vector<1x32xf32> to vector<16x32xf32>
    %436 = arith.addf %431, %435 : vector<16x32xf32>
    %c9 = arith.constant 9 : index
    %c0_241 = arith.constant 0 : index
    %437 = vector.load %arg9[%c9, %c0_241] : memref<15x32xf32, #tpu.memory_space<vmem>>, vector<1x32xf32>
    %438 = vector.shape_cast %437 : vector<1x32xf32> to vector<32xf32>
    %c10 = arith.constant 10 : index
    %c0_242 = arith.constant 0 : index
    %439 = vector.load %arg9[%c10, %c0_242] : memref<15x32xf32, #tpu.memory_space<vmem>>, vector<1x32xf32>
    %440 = vector.shape_cast %439 : vector<1x32xf32> to vector<32xf32>
    %cst_243 = arith.constant dense<0.000000e+00> : vector<16xf32>
    %441 = vector.multi_reduction <add>, %436, %cst_243 [1] : vector<16x32xf32> to vector<16xf32>
    %442 = vector.shape_cast %441 : vector<16xf32> to vector<16x1xf32>
    %cst_244 = arith.constant 3.200000e+01 : f32
    %443 = vector.broadcast %cst_244 : f32 to vector<16x1xf32>
    %444 = arith.divf %442, %443 : vector<16x1xf32>
    %445 = vector.broadcast %444 : vector<16x1xf32> to vector<16x32xf32>
    %446 = arith.subf %436, %445 : vector<16x32xf32>
    %447 = arith.mulf %446, %446 : vector<16x32xf32>
    %cst_245 = arith.constant dense<0.000000e+00> : vector<16xf32>
    %448 = vector.multi_reduction <add>, %447, %cst_245 [1] : vector<16x32xf32> to vector<16xf32>
    %449 = vector.shape_cast %448 : vector<16xf32> to vector<16x1xf32>
    %cst_246 = arith.constant 3.200000e+01 : f32
    %450 = vector.broadcast %cst_246 : f32 to vector<16x1xf32>
    %451 = arith.divf %449, %450 : vector<16x1xf32>
    %452 = vector.broadcast %444 : vector<16x1xf32> to vector<16x32xf32>
    %453 = arith.subf %436, %452 : vector<16x32xf32>
    %cst_247 = arith.constant 9.99999996E-13 : f32
    %454 = vector.broadcast %cst_247 : f32 to vector<16x1xf32>
    %455 = arith.addf %451, %454 : vector<16x1xf32>
    %456 = math.rsqrt %455 : vector<16x1xf32>
    %457 = vector.broadcast %456 : vector<16x1xf32> to vector<16x32xf32>
    %458 = arith.mulf %453, %457 : vector<16x32xf32>
    %459 = vector.shape_cast %438 : vector<32xf32> to vector<1x32xf32>
    %460 = vector.broadcast %459 : vector<1x32xf32> to vector<16x32xf32>
    %461 = arith.mulf %458, %460 : vector<16x32xf32>
    %462 = vector.shape_cast %440 : vector<32xf32> to vector<1x32xf32>
    %463 = vector.broadcast %462 : vector<1x32xf32> to vector<16x32xf32>
    %464 = arith.addf %461, %463 : vector<16x32xf32>
    %c1_248 = arith.constant 1 : index
    %c0_249 = arith.constant 0 : index
    %c0_250 = arith.constant 0 : index
    %c0_251 = arith.constant 0 : index
    %465 = vector.load %arg7[%c1_248, %c0_249, %c0_250, %c0_251] : memref<2x2x32x64xbf16, #tpu.memory_space<vmem>>, vector<1x1x32x64xbf16>
    %466 = vector.shape_cast %465 : vector<1x1x32x64xbf16> to vector<32x64xbf16>
    %467 = arith.truncf %464 : vector<16x32xf32> to vector<16x32xbf16>
    %cst_252 = arith.constant dense<0.000000e+00> : vector<16x64xf32>
    %468 = tpu.matmul %467, %466, %cst_252 {dimension_numbers = #tpu.dot_dimension_numbers<[1], [0], [0], [1], [0, 0, 1, 1], [], []>} : vector<16x32xbf16>, vector<32x64xbf16>, vector<16x64xf32> -> vector<16x64xf32>
    %c1_253 = arith.constant 1 : index
    %c0_254 = arith.constant 0 : index
    %c0_255 = arith.constant 0 : index
    %469 = vector.load %arg8[%c1_253, %c0_254, %c0_255] : memref<2x1x64xf32, #tpu.memory_space<vmem>>, vector<1x1x64xf32>
    %470 = vector.shape_cast %469 : vector<1x1x64xf32> to vector<64xf32>
    %471 = vector.shape_cast %470 : vector<64xf32> to vector<1x64xf32>
    %472 = vector.broadcast %471 : vector<1x64xf32> to vector<16x64xf32>
    %473 = arith.addf %468, %472 : vector<16x64xf32>
    %474 = arith.mulf %473, %473 : vector<16x64xf32>
    %475 = arith.mulf %473, %474 : vector<16x64xf32>
    %cst_256 = arith.constant 4.471500e-02 : f32
    %476 = vector.broadcast %cst_256 : f32 to vector<16x64xf32>
    %477 = arith.mulf %476, %475 : vector<16x64xf32>
    %478 = arith.addf %473, %477 : vector<16x64xf32>
    %cst_257 = arith.constant 0.797884583 : f32
    %479 = vector.broadcast %cst_257 : f32 to vector<16x64xf32>
    %480 = arith.mulf %479, %478 : vector<16x64xf32>
    %481 = math.tanh %480 : vector<16x64xf32>
    %cst_258 = arith.constant 1.000000e+00 : f32
    %482 = vector.broadcast %cst_258 : f32 to vector<16x64xf32>
    %483 = arith.addf %482, %481 : vector<16x64xf32>
    %cst_259 = arith.constant 5.000000e-01 : f32
    %484 = vector.broadcast %cst_259 : f32 to vector<16x64xf32>
    %485 = arith.mulf %484, %483 : vector<16x64xf32>
    %486 = arith.mulf %473, %485 : vector<16x64xf32>
    %c1_260 = arith.constant 1 : index
    %c1_261 = arith.constant 1 : index
    %c0_262 = arith.constant 0 : index
    %c0_263 = arith.constant 0 : index
    %487 = vector.load %arg7[%c1_260, %c1_261, %c0_262, %c0_263] : memref<2x2x32x64xbf16, #tpu.memory_space<vmem>>, vector<1x1x32x64xbf16>
    %488 = vector.shape_cast %487 : vector<1x1x32x64xbf16> to vector<32x64xbf16>
    %489 = arith.truncf %486 : vector<16x64xf32> to vector<16x64xbf16>
    %cst_264 = arith.constant dense<0.000000e+00> : vector<16x32xf32>
    %490 = tpu.matmul %489, %488, %cst_264 {dimension_numbers = #tpu.dot_dimension_numbers<[1], [1], [0], [0], [0, 0, 1, 0], [], []>} : vector<16x64xbf16>, vector<32x64xbf16>, vector<16x32xf32> -> vector<16x32xf32>
    %c11 = arith.constant 11 : index
    %c0_265 = arith.constant 0 : index
    %491 = vector.load %arg9[%c11, %c0_265] : memref<15x32xf32, #tpu.memory_space<vmem>>, vector<1x32xf32>
    %492 = vector.shape_cast %491 : vector<1x32xf32> to vector<32xf32>
    %493 = vector.shape_cast %492 : vector<32xf32> to vector<1x32xf32>
    %494 = vector.broadcast %493 : vector<1x32xf32> to vector<16x32xf32>
    %495 = arith.addf %490, %494 : vector<16x32xf32>
    %496 = arith.addf %464, %495 : vector<16x32xf32>
    %c12 = arith.constant 12 : index
    %c0_266 = arith.constant 0 : index
    %497 = vector.load %arg9[%c12, %c0_266] : memref<15x32xf32, #tpu.memory_space<vmem>>, vector<1x32xf32>
    %498 = vector.shape_cast %497 : vector<1x32xf32> to vector<32xf32>
    %c13 = arith.constant 13 : index
    %c0_267 = arith.constant 0 : index
    %499 = vector.load %arg9[%c13, %c0_267] : memref<15x32xf32, #tpu.memory_space<vmem>>, vector<1x32xf32>
    %500 = vector.shape_cast %499 : vector<1x32xf32> to vector<32xf32>
    %cst_268 = arith.constant dense<0.000000e+00> : vector<16xf32>
    %501 = vector.multi_reduction <add>, %496, %cst_268 [1] : vector<16x32xf32> to vector<16xf32>
    %502 = vector.shape_cast %501 : vector<16xf32> to vector<16x1xf32>
    %cst_269 = arith.constant 3.200000e+01 : f32
    %503 = vector.broadcast %cst_269 : f32 to vector<16x1xf32>
    %504 = arith.divf %502, %503 : vector<16x1xf32>
    %505 = vector.broadcast %504 : vector<16x1xf32> to vector<16x32xf32>
    %506 = arith.subf %496, %505 : vector<16x32xf32>
    %507 = arith.mulf %506, %506 : vector<16x32xf32>
    %cst_270 = arith.constant dense<0.000000e+00> : vector<16xf32>
    %508 = vector.multi_reduction <add>, %507, %cst_270 [1] : vector<16x32xf32> to vector<16xf32>
    %509 = vector.shape_cast %508 : vector<16xf32> to vector<16x1xf32>
    %cst_271 = arith.constant 3.200000e+01 : f32
    %510 = vector.broadcast %cst_271 : f32 to vector<16x1xf32>
    %511 = arith.divf %509, %510 : vector<16x1xf32>
    %512 = vector.broadcast %504 : vector<16x1xf32> to vector<16x32xf32>
    %513 = arith.subf %496, %512 : vector<16x32xf32>
    %cst_272 = arith.constant 9.99999996E-13 : f32
    %514 = vector.broadcast %cst_272 : f32 to vector<16x1xf32>
    %515 = arith.addf %511, %514 : vector<16x1xf32>
    %516 = math.rsqrt %515 : vector<16x1xf32>
    %517 = vector.broadcast %516 : vector<16x1xf32> to vector<16x32xf32>
    %518 = arith.mulf %513, %517 : vector<16x32xf32>
    %519 = vector.shape_cast %498 : vector<32xf32> to vector<1x32xf32>
    %520 = vector.broadcast %519 : vector<1x32xf32> to vector<16x32xf32>
    %521 = arith.mulf %518, %520 : vector<16x32xf32>
    %522 = vector.shape_cast %500 : vector<32xf32> to vector<1x32xf32>
    %523 = vector.broadcast %522 : vector<1x32xf32> to vector<16x32xf32>
    %524 = arith.addf %521, %523 : vector<16x32xf32>
    %525 = vector.extract_strided_slice %524 {offsets = [0, 0], sizes = [1, 32], strides = [1, 1]} : vector<16x32xf32> to vector<1x32xf32>
    %526 = vector.extract_strided_slice %524 {offsets = [8, 0], sizes = [1, 32], strides = [1, 1]} : vector<16x32xf32> to vector<1x32xf32>
    %527 = tpu.concatenate %525, %526 in 0 : vector<1x32xf32>, vector<1x32xf32> -> vector<2x32xf32>
    %c0_273 = arith.constant 0 : index
    %c0_274 = arith.constant 0 : index
    %528 = vector.load %arg10[%c0_273, %c0_274] : memref<32x32xbf16, #tpu.memory_space<vmem>>, vector<32x32xbf16>
    %529 = arith.truncf %527 : vector<2x32xf32> to vector<2x32xbf16>
    %cst_275 = arith.constant dense<0.000000e+00> : vector<2x32xf32>
    %530 = tpu.matmul %529, %528, %cst_275 {dimension_numbers = #tpu.dot_dimension_numbers<[1], [0], [0], [1], [0, 0, 1, 1], [], []>} : vector<2x32xbf16>, vector<32x32xbf16>, vector<2x32xf32> -> vector<2x32xf32>
    %c14 = arith.constant 14 : index
    %c0_276 = arith.constant 0 : index
    %531 = vector.load %arg9[%c14, %c0_276] : memref<15x32xf32, #tpu.memory_space<vmem>>, vector<1x32xf32>
    %532 = vector.shape_cast %531 : vector<1x32xf32> to vector<32xf32>
    %533 = vector.shape_cast %532 : vector<32xf32> to vector<1x32xf32>
    %534 = vector.broadcast %533 : vector<1x32xf32> to vector<2x32xf32>
    %535 = arith.addf %530, %534 : vector<2x32xf32>
    %536 = math.tanh %535 : vector<2x32xf32>
    %c0_277 = arith.constant 0 : index
    %c0_278 = arith.constant 0 : index
    %537 = vector.load %arg11[%c0_277, %c0_278] : memref<33x128xf32, #tpu.memory_space<vmem>>, vector<32x128xf32>
    %cst_279 = arith.constant dense<0.000000e+00> : vector<2x128xf32>
    %538 = tpu.matmul %536, %537, %cst_279 {dimension_numbers = #tpu.dot_dimension_numbers<[1], [0], [0], [1], [0, 0, 1, 1], [], []>} : vector<2x32xf32>, vector<32x128xf32>, vector<2x128xf32> -> vector<2x128xf32>
    %c32 = arith.constant 32 : index
    %c0_280 = arith.constant 0 : index
    %539 = vector.load %arg11[%c32, %c0_280] : memref<33x128xf32, #tpu.memory_space<vmem>>, vector<1x128xf32>
    %540 = vector.shape_cast %539 : vector<1x128xf32> to vector<128xf32>
    %541 = vector.shape_cast %540 : vector<128xf32> to vector<1x128xf32>
    %542 = vector.broadcast %541 : vector<1x128xf32> to vector<2x128xf32>
    %543 = arith.addf %538, %542 : vector<2x128xf32>
    %cst_281 = arith.constant 0.000000e+00 : f32
    %544 = vector.broadcast %cst_281 : f32 to vector<6x128xf32>
    %545 = tpu.concatenate %543, %544 in 0 : vector<2x128xf32>, vector<6x128xf32> -> vector<8x128xf32>
    %c0_282 = arith.constant 0 : index
    %c0_283 = arith.constant 0 : index
    %546 = vector.load %arg12[%c0_282, %c0_283] : memref<8x128xf32, #tpu.memory_space<vmem>>, vector<8x128xf32>
    tpu.vector_store %arg12[%c0_282, %c0_283], %545 {strides = array<i32>} : memref<8x128xf32, #tpu.memory_space<vmem>>, vector<8x128xf32>,
    return
  }
  func.func @transform_0(%arg0: i32) -> (i32, i32) {
    %c0_i32 = arith.constant 0 : i32
    %c0_i32_0 = arith.constant 0 : i32
    %c0_i32_1 = arith.constant 0 : i32
    return %c0_i32, %c0_i32_0 : i32, i32
  }
  func.func @transform_1(%arg0: i32) -> (i32, i32) {
    %c0_i32 = arith.constant 0 : i32
    %c0_i32_0 = arith.constant 0 : i32
    %c0_i32_1 = arith.constant 0 : i32
    return %c0_i32, %c0_i32_0 : i32, i32
  }
  func.func @transform_2(%arg0: i32) -> (i32, i32) {
    %c0_i32 = arith.constant 0 : i32
    %c0_i32_0 = arith.constant 0 : i32
    %c0_i32_1 = arith.constant 0 : i32
    return %c0_i32, %c0_i32_0 : i32, i32
  }
  func.func @transform_3(%arg0: i32) -> (i32, i32) {
    %c0_i32 = arith.constant 0 : i32
    %c0_i32_0 = arith.constant 0 : i32
    %c0_i32_1 = arith.constant 0 : i32
    return %c0_i32, %c0_i32_0 : i32, i32
  }
  func.func @transform_4(%arg0: i32) -> (i32, i32, i32, i32, i32) {
    %c0_i32 = arith.constant 0 : i32
    %c0_i32_0 = arith.constant 0 : i32
    %c0_i32_1 = arith.constant 0 : i32
    %c0_i32_2 = arith.constant 0 : i32
    %c0_i32_3 = arith.constant 0 : i32
    %c0_i32_4 = arith.constant 0 : i32
    return %c0_i32, %c0_i32_0, %c0_i32_1, %c0_i32_2, %c0_i32_3 : i32, i32, i32, i32, i32
  }
  func.func @transform_5(%arg0: i32) -> (i32, i32, i32, i32, i32) {
    %c0_i32 = arith.constant 0 : i32
    %c0_i32_0 = arith.constant 0 : i32
    %c0_i32_1 = arith.constant 0 : i32
    %c0_i32_2 = arith.constant 0 : i32
    %c0_i32_3 = arith.constant 0 : i32
    %c0_i32_4 = arith.constant 0 : i32
    return %c0_i32, %c0_i32_0, %c0_i32_1, %c0_i32_2, %c0_i32_3 : i32, i32, i32, i32, i32
  }
  func.func @transform_6(%arg0: i32) -> (i32, i32, i32, i32) {
    %c0_i32 = arith.constant 0 : i32
    %c0_i32_0 = arith.constant 0 : i32
    %c0_i32_1 = arith.constant 0 : i32
    %c0_i32_2 = arith.constant 0 : i32
    %c0_i32_3 = arith.constant 0 : i32
    return %c0_i32, %c0_i32_0, %c0_i32_1, %c0_i32_2 : i32, i32, i32, i32
  }
  func.func @transform_7(%arg0: i32) -> (i32, i32, i32) {
    %c0_i32 = arith.constant 0 : i32
    %c0_i32_0 = arith.constant 0 : i32
    %c0_i32_1 = arith.constant 0 : i32
    %c0_i32_2 = arith.constant 0 : i32
    return %c0_i32, %c0_i32_0, %c0_i32_1 : i32, i32, i32
  }
  func.func @transform_8(%arg0: i32) -> (i32, i32) {
    %c0_i32 = arith.constant 0 : i32
    %c0_i32_0 = arith.constant 0 : i32
    %c0_i32_1 = arith.constant 0 : i32
    return %c0_i32, %c0_i32_0 : i32, i32
  }
  func.func @transform_9(%arg0: i32) -> (i32, i32) {
    %c0_i32 = arith.constant 0 : i32
    %c0_i32_0 = arith.constant 0 : i32
    %c0_i32_1 = arith.constant 0 : i32
    return %c0_i32, %c0_i32_0 : i32, i32
  }
  func.func @transform_10(%arg0: i32) -> (i32, i32) {
    %c0_i32 = arith.constant 0 : i32
    %c0_i32_0 = arith.constant 0 : i32
    %c0_i32_1 = arith.constant 0 : i32
    return %c0_i32, %c0_i32_0 : i32, i32
  }
  func.func @transform_11(%arg0: i32) -> (i32, i32) {
    %c0_i32 = arith.constant 0 : i32
    %c0_i32_0 = arith.constant 0 : i32
    %c0_i32_1 = arith.constant 0 : i32
    return %c0_i32, %c0_i32_0 : i32, i32
  }
}

</mosaic_0001>

<bundles_post_ra>
// kernel: tpu_custom_call.1
= control target key start
LH: loop header
LB: loop body
LE: loop exit
PB: predicated region body
PF: predicated region fallthrough
CT: control target
= control target key end

     0   :  { %vm125_vm0 = vcmask 1044480   ;;  %v2288_v2 = vmov 0   ;;  %s2779_s0 = inlined_call_operand.vmem [shape: s32[16,1], index: 0, kind: input, shape index: {}]   ;;  %s2780_s1 = inlined_call_operand.vmem [shape: s32[16,1], index: 1, kind: input, shape index: {}]   ;;  %s2781_s2 = inlined_call_operand.vmem [shape: f32[2,8], index: 2, kind: input, shape index: {}]   ;;  %s2782_s3 = inlined_call_operand.vmem [shape: bf16[74,32], index: 3, kind: input, shape index: {}]   ;;  %s2783_s4 = inlined_call_operand.vmem [shape: bf16[2,4,2,32,16], index: 4, kind: input, shape index: {}]   ;;  %s2784_s5 = inlined_call_operand.vmem [shape: f32[2,3,2,1,16], index: 5, kind: input, shape index: {}]   ;;  %s2785_s6 = inlined_call_operand.vmem [shape: bf16[2,2,32,64], index: 6, kind: input, shape index: {}]   ;;  %s2786_s7 = inlined_call_operand.vmem [shape: f32[2,1,64], index: 7, kind: input, shape index: {}]   ;;  %s2787_s8 = inlined_call_operand.vmem [shape: f32[15,32], index: 8, kind: input, shape index: {}]   ;;  %s2788_s9 = inlined_call_operand.vmem [shape: bf16[32,32], index: 9, kind: input, shape index: {}]   ;;  %s2789_s10 = inlined_call_operand.vmem [shape: f32[33,128], index: 10, kind: input, shape index: {}]   ;;  %s2790_s11 = inlined_call_operand.hbm [shape: f32[8,128], index: 11, kind: output, shape index: {}]  }
   0x1   :  { %v45_v0 = vld [vmem:[%s2779_s0] sm:$0xff]  ;;  %2166 = vset.pattern.permute.xlu0 %v2288_v2  ;;  %2167 = vset.pattern.permute.xlu1 %v2288_v2  ;;  %v56_v4 = vld [vmem:[%s2780_s1 + $0x8] sm:$0xff] }
   0x2   :  { %v55_v1 = vld [vmem:[%s2780_s1] sm:$0xff]  ;;  %48 = vperm.xlu0 %2166, %v45_v0   ;;  %v58_v8 = vadd.s32 64, %v56_v4  ;;  %v46_v10 = vld [vmem:[%s2779_s0 + $0x8] sm:$0xff] }
   0x3   :  { %v57_v3 = vadd.s32 64, %v55_v1  ;;  %v1814_v5 = vld [vmem:[%s2782_s3 + $0x20] sm:$0xf]  ;;  %v2119_v6 = vld [vmem:[%s2782_s3 + $0x20] sm:$0x10] }
   0x4   :  { %v1815_v7 = vor.u32 %v2119_v6, %v1814_v5 }
   0x5   :  { %60 = vperm.xlu1 %2167, %v57_v3  }
   0x6   :  { %v127_v9 = vsel %vm125_vm0, %v1815_v7, 0 }
   0x7   :  { %132 = vmatpush.bf16.msra.mxu0 %v127_v9 }
   0xa   :  { %51 = vperm.xlu0 %2166, %v46_v10  }
   0xd   :  { %63 = vperm.xlu1 %2167, %v58_v8  }
   0xe   :  { %16 = vsyncpa [#allocation3], 0  ;;  %v2118_v11 = vld [vmem:[%s2782_s3 + $0x18] sm:$0xff]  ;;  %v2117_v12 = vld [vmem:[%s2782_s3 + $0x10] sm:$0xff]  ;;  %v40_v15 = vlaneseq  ;;  %v2289_v27 = vmov 0.0   ;;  %vm121_vm11 = vcmask 605184  }
   0xf   :  { %133 = vmatpush.bf16.msra.mxu0 %v2118_v11  ;;  %v2116_v13 = vld [vmem:[%s2782_s3 + $0x8] sm:$0xff]  ;;  %v2115_v14 = vld [vmem:[%s2782_s3] sm:$0xff]  ;;  %vm145_vm12 = vcmask 261120   ;;  %v2290_v35 = vmov 32.0   ;;  %v2133_v55 = vld [vmem:[%s2783_s4 + $0x58] sm:$0xff]  ;;  %s2291_s25 = smov [#allocation2]  }
  0x10   :  { %v43_v16 = vshrl.u32 %v40_v15, 7  ;;  %v41_v20 = vand.u32 127, %v40_v15  ;;  %2198 = vrcp.f32 %v2290_v35  ;;  %v2121_v52 = vld [vmem:[%s2783_s4 + $0x8] sm:$0xff]  ;;  %v2120_v58 = vld [vmem:[%s2783_s4] sm:$0xff]  ;;  %v2132_v62 = vld [vmem:[%s2783_s4 + $0x50] sm:$0xff]  ;;  %s1783_s26 = sshll.u32 %s2291_s25, 4  ;;  %s1784_s26 = int_to_ptr.vmem [resolvable:$true] %s1783_s26 }
  0x11   :  { %v2123_v53 = vld [vmem:[%s2783_s4 + $0x28] sm:$0xff]  ;;  %236 = vmatpush.bf16.msra.mxu1 %v2121_v52  ;;  %v2122_v59 = vld [vmem:[%s2783_s4 + $0x20] sm:$0xff] }
  0x12   :  { %v44_v17 = vadd.s32 8, %v43_v16  ;;  %v69_v18 = vand.u32 7, %v43_v16  ;;  %v2125_v54 = vld [vmem:[%s2783_s4 + $0x48] sm:$0xff]  ;;  %272 = vmatpush.bf16.msra.mxu2 %v2123_v53  ;;  %v2124_v60 = vld [vmem:[%s2783_s4 + $0x40] sm:$0xff] }
  0x13   :  { %134 = vmatpush.bf16.msra.mxu0 %v2117_v12  ;;  %308 = vmatpush.bf16.msra.mxu3 %v2125_v54 }
  0x14   :  { %v70_v22 = vand.u32 7, %v44_v17  ;;  %v71_v23 = vadd.s32 66, %v69_v18  ;;  %v2169_v18 = vld [vmem:[%s2787_s8 + $0x1] ss:$0 sm:$0xff] }
  0x15   :  { %237 = vmatpush.bf16.msra.mxu1 %v2120_v58 }
  0x16   :  { %v72_v24 = vadd.s32 66, %v70_v22  ;;  %vm73_vm4 = vcmp.eq.s32.totalorder %v41_v20, %v71_v23  ;;  %v2199_v36 = vpop.eup %2198  ;;  %273 = vmatpush.bf16.msra.mxu2 %v2122_v59 }
  0x17   :  { %135 = vmatpush.bf16.msra.mxu0 %v2116_v13  ;;  %v153_v37 = vmul.f32 32.0, %v2199_v36  ;;  %vm157_vm13 = vweird.f32 %v2199_v36  ;;  %309 = vmatpush.bf16.msra.mxu3 %v2124_v60 }
  0x18   :  { %vm74_vm6 = vcmp.eq.s32.totalorder %v41_v20, %v72_v24 }
  0x19   :  { %v154_v38 = vsub.f32 1.0, %v153_v37 }
  0x1b   :  { %136 = vmatpush.bf16.msra.mxu0 %v2115_v14  ;;  %v155_v39 = vmul.f32 %v2199_v36, %v154_v38  ;;  %v2168_v14 = vld [vmem:[%s2787_s8] ss:$0 sm:$0xff]  ;;  %v2131_v38 = vld [vmem:[%s2783_s4 + $0x38] sm:$0xff] }
  0x1d   :  { %v156_v40 = vadd.f32 %v2199_v36, %v155_v39 }
  0x1f   :  { %v2384_v41 = vsel %vm157_vm13, %v2199_v36, %v156_v40  ;;  %546 = vmatpush.bf16.msrb.mxu0 %v2133_v55  ;;  %vm878_vm13 = vcmask 523264  }
  0x23   :  { %547 = vmatpush.bf16.msrb.mxu0 %v2132_v62 }
  0x74   :  { %v49_v19 = vpop.permute.xlu0 %48 }
  0x75   :  { %vm53_vm1 = vcmp.eq.s32.totalorder %v41_v20, %v49_v19 }
  0x77   :  { %v61_v21 = vpop.permute.xlu1 %60 }
  0x78   :  { %vm65_vm2 = vcmp.eq.s32.totalorder %v41_v20, %v61_v21 }
  0x79   :  { %vm67_vm3 = vmor %vm53_vm1, %vm65_vm2 }
  0x7a   :  { %vm75_vm7 = vmor %vm67_vm3, %vm73_vm4  ;;  %vm317_vm4 = vcmask 130048  }
  0x7b   :  { %v1794_v28 = vsel %vm75_vm7, 1.0, %v2289_v27 }
  0x7c   :  { %v52_v25 = vpop.permute.xlu0 %51 }
  0x7d   :  { %vm54_vm5 = vcmp.eq.s32.totalorder %v41_v20, %v52_v25  ;;  %v2171_v25 = vld [vmem:[%s2784_s5 + $0x5] ss:$0 sm:$0xff] }
  0x7f   :  { %v64_v26 = vpop.permute.xlu1 %63 }
  0x80   :  { %vm66_vm8 = vcmp.eq.s32.totalorder %v41_v20, %v64_v26 }
  0x81   :  { %vm68_vm9 = vmor %vm54_vm5, %vm66_vm8  ;;  %vm344_vm5 = vcmask 64512  }
  0x82   :  { %vm76_vm10 = vmor %vm68_vm9, %vm74_vm6 }
  0x83   :  { %v1795_v29 = vsel %vm76_vm10, 1.0, %v2289_v27 }
  0x84   :  { %v91_v30 = vpack.c.bf16 %v1795_v29, %v1794_v28  ;;  %v2172_v28 = vld [vmem:[%s2784_s5 + $0x2] ss:$0 sm:$0xff]  ;;  %v2173_v29 = vld [vmem:[%s2784_s5 + $0x4] ss:$0 sm:$0xff] }
  0x86   :  { %1816 = vmatmul.msk.bf16.vlgmr.msra.gmra.mxu0 %vm121_vm11, %v91_v30 }
 0x103   :  { %v138_v31 = vpop.f32.mrf.mxu0 }
 0x104   :  { %v146_v32 = vsel %vm145_vm12, %v138_v31, 0.0 }
 0x105   :  { %147 = vadd.xlane.f32.xlu2 %v146_v32 }
 0x10b   :  { %v140_v33 = vpop.f32.mrf.mxu0 }
 0x10c   :  { %v149_v34 = vsel %vm145_vm12, %v140_v33, 0.0 }
 0x10d   :  { %150 = vadd.xlane.f32.xlu2 %v149_v34 }
 0x178   :  { %v148_v42 = vpop.xlane.xlu2 %147 }
 0x179   :  { %v159_v43 = vmul.f32 %v2384_v41, %v148_v42 }
 0x17b   :  { %v161_v44 = vsub.f32 %v138_v31, %v159_v43  ;;  %v2170_v31 = vld [vmem:[%s2784_s5] ss:$0 sm:$0xff] }
 0x17d   :  { %v163_v45 = vmul.f32 %v161_v44, %v161_v44 }
 0x17f   :  { %v165_v46 = vsel %vm145_vm12, %v163_v45, 0.0 }
 0x180   :  { %166 = vadd.xlane.f32.xlu0 %v165_v46  ;;  %v151_v47 = vpop.xlane.xlu2 %150  ;;  %v2130_v46 = vld [vmem:[%s2783_s4 + $0x30] sm:$0xff] }
 0x181   :  { %v160_v48 = vmul.f32 %v2384_v41, %v151_v47 }
 0x183   :  { %v162_v49 = vsub.f32 %v140_v33, %v160_v48  ;;  %v203_v48 = vld [vmem:[%s2781_s2] sm:$0x3]  ;;  %s1785_s2 = sshll.u32 %s2790_s11, 4  ;;  %s1786_s2 = int_to_ptr.hbm [resolvable:$true] %s1785_s2 }
 0x185   :  { %v164_v50 = vmul.f32 %v162_v49, %v162_v49 }
 0x187   :  { %v168_v51 = vsel %vm145_vm12, %v164_v50, 0.0 }
 0x188   :  { %169 = vadd.xlane.f32.xlu1 %v168_v51 }
 0x1f3   :  { %v167_v56 = vpop.xlane.xlu0 %166 }
 0x1f4   :  { %v171_v57 = vmul.f32 %v167_v56, %v2384_v41  ;;  %v2174_v56 = vld [vmem:[%s2784_s5 + $0x3] ss:$0 sm:$0xff] }
 0x1f6   :  { %v173_v61 = vadd.f32 1e-12, %v171_v57 }
 0x1f8   :  { %2200 = vrsqrt.f32 %v173_v61  ;;  %vm181_vm15 = vweird.f32 %v173_v61 }
 0x1fb   :  { %v170_v63 = vpop.xlane.xlu1 %169 }
 0x1fc   :  { %v172_v0 = vmul.f32 %v170_v63, %v2384_v41 }
 0x1fe   :  { %v2201_v1 = vpop.eup %2200  ;;  %v174_v2 = vadd.f32 1e-12, %v172_v0 }
 0x1ff   :  { %v176_v3 = vmul.f32 %v2201_v1, %v173_v61  ;;  %vm182_vm14 = vweird.f32 %v2201_v1 }
 0x200   :  { %2202 = vrsqrt.f32 %v174_v2  ;;  %vm183_vm0 = vmor %vm181_vm15, %vm182_vm14  ;;  %vm191_vm2 = vweird.f32 %v174_v2 }
 0x201   :  { %v177_v4 = vmul.f32 %v2201_v1, %v176_v3  ;;  %v2129_v3 = vld [vmem:[%s2783_s4 + $0x18] sm:$0xff] }
 0x203   :  { %v178_v5 = vmul.f32 0.5, %v177_v4  ;;  %v2128_v4 = vld [vmem:[%s2783_s4 + $0x10] sm:$0xff] }
 0x205   :  { %v179_v6 = vsub.f32 1.5, %v178_v5 }
 0x206   :  { %v2203_v7 = vpop.eup %2202 }
 0x207   :  { %v180_v8 = vmul.f32 %v2201_v1, %v179_v6  ;;  %v186_v9 = vmul.f32 %v2203_v7, %v174_v2  ;;  %vm192_vm1 = vweird.f32 %v2203_v7 }
 0x208   :  { %vm193_vm3 = vmor %vm191_vm2, %vm192_vm1 }
 0x209   :  { %v187_v10 = vmul.f32 %v2203_v7, %v186_v9  ;;  %v184_v11 = vsel %vm183_vm0, %v2201_v1, %v180_v8 }
 0x20a   :  { %v195_v15 = vmul.f32 %v184_v11, %v161_v44 }
 0x20b   :  { %v188_v12 = vmul.f32 0.5, %v187_v10 }
 0x20c   :  { %v198_v19 = vmul.f32 %v2168_v14, %v195_v15 }
 0x20d   :  { %v189_v13 = vsub.f32 1.5, %v188_v12 }
 0x20e   :  { %v2422_v22 = vadd.f32 %v2169_v18, %v198_v19  ;;  %v2175_v19 = vld [vmem:[%s2784_s5 + $0x1] ss:$0 sm:$0xff] }
 0x20f   :  { %v190_v16 = vmul.f32 %v2203_v7, %v189_v13 }
 0x211   :  { %v194_v17 = vsel %vm193_vm3, %v2203_v7, %v190_v16 }
 0x212   :  { %v196_v20 = vmul.f32 %v194_v17, %v162_v49  ;;  %v204_v49 = vsub.f32 1.0, %v203_v48  ;;  %v2135_v48 = vld [vmem:[%s2783_s4 + $0x78] sm:$0xff] }
 0x214   :  { %v199_v21 = vmul.f32 %v2168_v14, %v196_v20  ;;  %v205_v50 = vmul.f32 -1e+09, %v204_v49  ;;  %v697_v49 = vsel %vm317_vm4, %v2135_v48, 0  ;;  %v2178_v48 = vld [vmem:[%s2787_s8 + $0x4] ss:$0 sm:$0xff] }
 0x215   :  { %705 = vmatpush.bf16.xpose.msra.mxu0 %v697_v49 }
 0x216   :  { %v2424_v23 = vadd.f32 %v2169_v18, %v199_v21  ;;  %v2467_v51 = vperm.slane %v205_v50, 0  ;;  %v2475_v63 = vperm.slane %v205_v50, 1  ;;  %v2134_v50 = vld [vmem:[%s2783_s4 + $0x70] sm:$0xff] }
 0x218   :  { %v2428_v24 = vpack.c.bf16 %v2424_v23, %v2422_v22 }
 0x21a   :  { %1825 = vmatmul.msk.bf16.vlgmr.msra.gmra.mxu1 %vm145_vm12, %v2428_v24  ;;  %1839 = vmatmul.msk.bf16.vlgmr.msra.gmra.mxu2 %vm145_vm12, %v2428_v24 }
 0x21b   :  { %1853 = vmatmul.msk.bf16.vlgmr.msra.gmra.mxu3 %vm145_vm12, %v2428_v24  ;;  %1905 = vmatmul.msk.bf16.vlgmr.msrb.gmra.mxu0 %vm145_vm12, %v2428_v24 }
 0x297   :  { %v239_v30 = vpop.f32.mrf.mxu1 }
 0x298   :  { %v549_v26 = vpop.f32.mrf.mxu0  ;;  %v240_v36 = vadd.f32 %v2170_v31, %v239_v30 }
 0x299   :  { %v2441_v27 = vadd.f32 %v2171_v25, %v549_v26 }
 0x29d   :  { %v275_v32 = vpop.f32.mrf.mxu2 }
 0x29e   :  { %v276_v33 = vadd.f32 %v2172_v28, %v275_v32  ;;  %v311_v34 = vpop.f32.mrf.mxu3 }
 0x29f   :  { %v312_v35 = vadd.f32 %v2173_v29, %v311_v34  ;;  %v241_v39 = vpop.f32.mrf.mxu1 }
 0x2a0   :  { %1854 = vmatpush.xpose.msk.msrb.mxu1 %vm317_vm4, %v276_v33  ;;  %v242_v44 = vadd.f32 %v2170_v31, %v241_v39  ;;  %v551_v45 = vpop.f32.mrf.mxu0 }
 0x2a1   :  { %374 = vmatpush.msrb.mxu2 %v312_v35  ;;  %v552_v47 = vadd.f32 %v2171_v25, %v551_v45 }
 0x2a3   :  { %1855 = vmatmul.msk.f32.vlgmr.msrb.gmra.mxu1 %vm317_vm4, %v240_v36  ;;  %474 = vmatpush.bf16.msra.mxu2 %v2129_v3  ;;  %v2176_v3 = vld [vmem:[%s2787_s8 + $0x2] ss:$0 sm:$0xff] }
 0x2a5   :  { %v277_v37 = vpop.f32.mrf.mxu2 }
 0x2a6   :  { %v278_v40 = vadd.f32 %v2172_v28, %v277_v37  ;;  %v313_v42 = vpop.f32.mrf.mxu3 }
 0x2a7   :  { %v314_v43 = vadd.f32 %v2173_v29, %v313_v42  ;;  %475 = vmatpush.bf16.msra.mxu2 %v2128_v4 }
 0x2a8   :  { %1857 = vmatpush.xpose.msk.msrb.mxu3 %vm317_vm4, %v278_v40 }
 0x2a9   :  { %435 = vmatpush.msra.mxu1 %v314_v43 }
 0x2ab   :  { %1858 = vmatmul.msk.f32.vlgmr.msrb.gmra.mxu3 %vm317_vm4, %v242_v44  ;;  %v2127_v44 = vld [vmem:[%s2783_s4 + $0x68] sm:$0xff] }
 0x2ac   :  { %510 = vmatpush.bf16.msra.mxu3 %v2131_v38  ;;  %v730_v45 = vsel %vm317_vm4, %v2127_v44, 0  ;;  %v2177_v44 = vld [vmem:[%s2787_s8 + $0x3] ss:$0 sm:$0xff] }
 0x2b0   :  { %511 = vmatpush.bf16.msra.mxu3 %v2130_v46  ;;  %v2126_v46 = vld [vmem:[%s2783_s4 + $0x60] sm:$0xff] }
 0x2b3   :  { %1891 = vmatmul.msk.bf16.vlgmr.msra.gmra.mxu3 %vm145_vm12, %v2428_v24 }
 0x2b4   :  { %669 = vmatpush.msrb.mxu3 %v552_v47  ;;  %v727_v47 = vsel %vm317_vm4, %v2126_v46, 0 }
 0x320   :  { %v341_v52 = vpop.f32.mrf.mxu1 }
 0x321   :  { %v342_v53 = vadd.f32 %v341_v52, %v2467_v51 }
 0x323   :  { %v345_v54 = vsel %vm344_vm5, %v342_v53, -inf }
 0x324   :  { %346 = vmax.xlane.f32.xlu2 %v345_v54 }
 0x32e   :  { %v403_v55 = vpop.f32.mrf.mxu3 }
 0x32f   :  { %v404_v1 = vadd.f32 %v403_v55, %v2475_v63 }
 0x331   :  { %v406_v2 = vsel %vm344_vm5, %v404_v1, -inf }
 0x336   :  { %v513_v57 = vpop.f32.mrf.mxu3 }
 0x337   :  { %v514_v58 = vadd.f32 %v2174_v56, %v513_v57 }
 0x339   :  { %1906 = vmatpush.xpose.msk.msrb.mxu1 %vm317_vm4, %v514_v58 }
 0x33e   :  { %v515_v6 = vpop.f32.mrf.mxu3 }
 0x33f   :  { %v516_v10 = vadd.f32 %v2174_v56, %v515_v6 }
 0x397   :  { %v347_v59 = vpop.xlane.xlu2 %346 }
 0x398   :  { %v348_v60 = vsub.f32 %v342_v53, %v347_v59  ;;  %v694_v53 = vsel %vm317_vm4, %v2134_v50, 0 }
 0x399   :  { %706 = vmatpush.bf16.xpose.msra.mxu0 %v694_v53 }
 0x39a   :  { %v349_v61 = vmul.f32 1.442695, %v348_v60 }
 0x39c   :  { %2204 = vpow2.f32 %v349_v61 }
 0x3a2   :  { %v2205_v62 = vpop.eup %2204 }
 0x3a3   :  { %v351_v0 = vsel %vm344_vm5, %v2205_v62, 0.0 }
 0x3a4   :  { %352 = vadd.xlane.f32.xlu2 %v351_v0 }
 0x3ac   :  { %407 = vmax.xlane.f32.xlu2 %v406_v2 }
 0x417   :  { %v353_v5 = vpop.xlane.xlu2 %352 }
 0x418   :  { %2206 = vrcp.f32 %v353_v5 }
 0x41e   :  { %v2207_v7 = vpop.eup %2206 }
 0x41f   :  { %v408_v8 = vpop.xlane.xlu2 %407  ;;  %v355_v9 = vmul.f32 %v2207_v7, %v2205_v62 }
 0x420   :  { %v409_v11 = vsub.f32 %v404_v1, %v408_v8 }
 0x421   :  { %1856 = vmatmul.msk.f32.vlgmr.msrb.gmra.mxu2 %vm344_vm5, %v355_v9 }
 0x422   :  { %v410_v12 = vmul.f32 1.442695, %v409_v11  ;;  %1909 = vmatpush.xpose.msk.msrb.mxu2 %vm317_vm4, %v516_v10 }
 0x424   :  { %2208 = vpow2.f32 %v410_v12 }
 0x429   :  { %1877 = vmatmul.msk.bf16.vlgmr.msra.gmra.mxu2 %vm145_vm12, %v2428_v24 }
 0x42a   :  { %v2209_v13 = vpop.eup %2208 }
 0x42b   :  { %v412_v14 = vsel %vm344_vm5, %v2209_v13, 0.0 }
 0x42c   :  { %413 = vadd.xlane.f32.xlu2 %v412_v14 }
 0x49f   :  { %v414_v15 = vpop.xlane.xlu2 %413 }
 0x4a0   :  { %2210 = vrcp.f32 %v414_v15 }
 0x4a4   :  { %v376_v16 = vpop.f32.mrf.mxu2 }
 0x4a6   :  { %v2211_v17 = vpop.eup %2210 }
 0x4a7   :  { %v416_v18 = vmul.f32 %v2211_v17, %v2209_v13 }
 0x4a9   :  { %1859 = vmatmul.msk.f32.vlgmr.msra.gmra.mxu1 %vm344_vm5, %v416_v18 }
 0x4aa   :  { %609 = vmatpush.msra.mxu1 %v2441_v27 }
 0x4ac   :  { %v477_v20 = vpop.f32.mrf.mxu2 }
 0x4ad   :  { %v478_v21 = vadd.f32 %v2175_v19, %v477_v20 }
 0x4b1   :  { %1907 = vmatmul.msk.f32.vlgmr.msrb.gmra.mxu1 %vm317_vm4, %v478_v21 }
 0x4b2   :  { %738 = vmatpush.bf16.xpose.msrb.mxu1 %v730_v45 }
 0x4b4   :  { %v479_v24 = vpop.f32.mrf.mxu2 }
 0x4b5   :  { %v480_v25 = vadd.f32 %v2175_v19, %v479_v24 }
 0x4b7   :  { %1910 = vmatmul.msk.f32.vlgmr.msrb.gmra.mxu2 %vm317_vm4, %v480_v25 }
 0x4ba   :  { %739 = vmatpush.bf16.xpose.msrb.mxu1 %v727_v47 }
 0x526   :  { %v437_v26 = vpop.f32.mrf.mxu1 }
 0x527   :  { %v445_v59 = vpack.c.bf16 %v437_v26, %v376_v16 }
 0x52e   :  { %v577_v31 = vpop.f32.mrf.mxu1 }
 0x52f   :  { %v578_v27 = vadd.f32 %v577_v31, %v2467_v51 }
 0x531   :  { %v580_v32 = vsel %vm344_vm5, %v578_v27, -inf }
 0x53a   :  { %v637_v28 = vpop.f32.mrf.mxu2 }
 0x53b   :  { %v638_v29 = vadd.f32 %v637_v28, %v2475_v63  ;;  %v2136_v28 = vld [vmem:[%s2785_s6] sm:$0xff] }
 0x53d   :  { %v640_v30 = vsel %vm344_vm5, %v638_v29, -inf }
 0x53e   :  { %641 = vmax.xlane.f32.xlu2 %v640_v30 }
 0x546   :  { %581 = vmax.xlane.f32.xlu2 %v580_v32 }
 0x5b1   :  { %v642_v33 = vpop.xlane.xlu2 %641 }
 0x5b2   :  { %v643_v34 = vsub.f32 %v638_v29, %v642_v33 }
 0x5b4   :  { %v644_v35 = vmul.f32 1.442695, %v643_v34 }
 0x5b6   :  { %2212 = vpow2.f32 %v644_v35 }
 0x5b9   :  { %v582_v36 = vpop.xlane.xlu2 %581 }
 0x5ba   :  { %v583_v37 = vsub.f32 %v578_v27, %v582_v36 }
 0x5bc   :  { %v2213_v38 = vpop.eup %2212  ;;  %v584_v39 = vmul.f32 1.442695, %v583_v37 }
 0x5bd   :  { %v646_v40 = vsel %vm344_vm5, %v2213_v38, 0.0 }
 0x5be   :  { %2214 = vpow2.f32 %v584_v39  ;;  %647 = vadd.xlane.f32.xlu0 %v646_v40 }
 0x5c4   :  { %v2215_v42 = vpop.eup %2214 }
 0x5c5   :  { %v586_v43 = vsel %vm344_vm5, %v2215_v42, 0.0 }
 0x5c6   :  { %587 = vadd.xlane.f32.xlu1 %v586_v43 }
 0x631   :  { %v648_v52 = vpop.xlane.xlu0 %647 }
 0x632   :  { %2216 = vrcp.f32 %v648_v52 }
 0x638   :  { %v2217_v54 = vpop.eup %2216 }
 0x639   :  { %v650_v55 = vmul.f32 %v2217_v54, %v2213_v38  ;;  %v588_v56 = vpop.xlane.xlu1 %587 }
 0x63a   :  { %2218 = vrcp.f32 %v588_v56  ;;  %v2139_v56 = vld [vmem:[%s2785_s6 + $0x18] sm:$0xff] }
 0x63b   :  { %1911 = vmatmul.msk.f32.vlgmr.msrb.gmra.mxu3 %vm344_vm5, %v650_v55 }
 0x640   :  { %v2219_v57 = vpop.eup %2218 }
 0x641   :  { %v590_v58 = vmul.f32 %v2219_v57, %v2215_v42  ;;  %v886_v57 = vsel %vm878_vm13, %v2139_v56, 0 }
 0x642   :  { %894 = vmatpush.bf16.xpose.msra.mxu3 %v886_v57 }
 0x643   :  { %1908 = vmatmul.msk.f32.vlgmr.msra.gmra.mxu1 %vm344_vm5, %v590_v58  ;;  %v2138_v58 = vld [vmem:[%s2785_s6 + $0x10] sm:$0xff] }
 0x64b   :  { %1933 = vmatmul.msk.bf16.vlgmr.msrb.gmra.mxu1 %vm317_vm4, %v445_v59  ;;  %v2179_v59 = vld [vmem:[%s2786_s7] ss:$0 sm:$0xff] }
 0x6be   :  { %v671_v60 = vpop.f32.mrf.mxu3 }
 0x6c0   :  { %v611_v61 = vpop.f32.mrf.mxu1 }
 0x6c1   :  { %v679_v62 = vpack.c.bf16 %v671_v60, %v611_v61  ;;  %v883_v60 = vsel %vm878_vm13, %v2138_v58, 0 }
 0x6c2   :  { %895 = vmatpush.bf16.xpose.msra.mxu3 %v883_v60 }
 0x6c3   :  { %1924 = vmatmul.msk.bf16.vlgmr.msra.gmra.mxu0 %vm317_vm4, %v679_v62 }
 0x6c8   :  { %v741_v0 = vpop.f32.mrf.mxu1 }
 0x6d0   :  { %v743_v7 = vpop.f32.mrf.mxu1 }
 0x740   :  { %v708_v1 = vpop.f32.mrf.mxu0 }
 0x741   :  { %v742_v2 = vadd.f32 %v741_v0, %v708_v1 }
 0x743   :  { %v746_v4 = vadd.f32 %v742_v2, %v2422_v22 }
 0x745   :  { %v750_v5 = vadd.f32 %v2176_v3, %v746_v4 }
 0x747   :  { %v754_v6 = vsel %vm145_vm12, %v750_v5, 0.0 }
 0x748   :  { %755 = vadd.xlane.f32.xlu2 %v754_v6  ;;  %v710_v8 = vpop.f32.mrf.mxu0 }
 0x749   :  { %v744_v9 = vadd.f32 %v743_v7, %v710_v8 }
 0x74b   :  { %v747_v10 = vadd.f32 %v744_v9, %v2424_v23  ;;  %v2137_v23 = vld [vmem:[%s2785_s6 + $0x8] sm:$0xff] }
 0x74c   :  { %834 = vmatpush.bf16.msra.mxu2 %v2137_v23 }
 0x74d   :  { %v751_v11 = vadd.f32 %v2176_v3, %v747_v10 }
 0x74f   :  { %v757_v12 = vsel %vm145_vm12, %v751_v11, 0.0 }
 0x750   :  { %758 = vadd.xlane.f32.xlu0 %v757_v12  ;;  %835 = vmatpush.bf16.msra.mxu2 %v2136_v28 }
 0x7bb   :  { %v756_v13 = vpop.xlane.xlu2 %755 }
 0x7bc   :  { %v760_v14 = vmul.f32 %v756_v13, %v2384_v41 }
 0x7be   :  { %v762_v15 = vsub.f32 %v750_v5, %v760_v14 }
 0x7c0   :  { %v764_v16 = vmul.f32 %v762_v15, %v762_v15 }
 0x7c2   :  { %v766_v22 = vsel %vm145_vm12, %v764_v16, 0.0 }
 0x7c3   :  { %767 = vadd.xlane.f32.xlu1 %v766_v22  ;;  %v759_v17 = vpop.xlane.xlu0 %758 }
 0x7c4   :  { %v761_v18 = vmul.f32 %v759_v17, %v2384_v41 }
 0x7c6   :  { %v763_v19 = vsub.f32 %v751_v11, %v761_v18 }
 0x7c8   :  { %v765_v20 = vmul.f32 %v763_v19, %v763_v19 }
 0x7ca   :  { %v769_v21 = vsel %vm145_vm12, %v765_v20, 0.0  ;;  %v2180_v20 = vld [vmem:[%s2787_s8 + $0x5] ss:$0 sm:$0xff] }
 0x7cb   :  { %770 = vadd.xlane.f32.xlu2 %v769_v21 }
 0x836   :  { %v768_v24 = vpop.xlane.xlu1 %767 }
 0x837   :  { %v772_v25 = vmul.f32 %v768_v24, %v2384_v41 }
 0x839   :  { %v774_v26 = vadd.f32 1e-12, %v772_v25 }
 0x83b   :  { %2220 = vrsqrt.f32 %v774_v26  ;;  %vm782_vm7 = vweird.f32 %v774_v26 }
 0x83e   :  { %v771_v29 = vpop.xlane.xlu2 %770 }
 0x83f   :  { %v773_v30 = vmul.f32 %v771_v29, %v2384_v41 }
 0x841   :  { %v2221_v31 = vpop.eup %2220  ;;  %v775_v27 = vadd.f32 1e-12, %v773_v30 }
 0x842   :  { %v777_v32 = vmul.f32 %v2221_v31, %v774_v26  ;;  %vm783_vm6 = vweird.f32 %v2221_v31 }
 0x843   :  { %2222 = vrsqrt.f32 %v775_v27  ;;  %vm784_vm8 = vmor %vm782_vm7, %vm783_vm6  ;;  %vm792_vm10 = vweird.f32 %v775_v27 }
 0x844   :  { %v778_v33 = vmul.f32 %v2221_v31, %v777_v32 }
 0x846   :  { %v779_v34 = vmul.f32 0.5, %v778_v33 }
 0x848   :  { %v780_v35 = vsub.f32 1.5, %v779_v34 }
 0x849   :  { %v2223_v36 = vpop.eup %2222 }
 0x84a   :  { %v781_v37 = vmul.f32 %v2221_v31, %v780_v35  ;;  %v787_v38 = vmul.f32 %v2223_v36, %v775_v27  ;;  %vm793_vm9 = vweird.f32 %v2223_v36 }
 0x84b   :  { %vm794_vm11 = vmor %vm792_vm10, %vm793_vm9 }
 0x84c   :  { %v788_v39 = vmul.f32 %v2223_v36, %v787_v38  ;;  %v785_v40 = vsel %vm784_vm8, %v2221_v31, %v781_v37 }
 0x84d   :  { %v796_v45 = vmul.f32 %v785_v40, %v762_v15  ;;  %v2141_v40 = vld [vmem:[%s2783_s4 + $0x88] sm:$0xff] }
 0x84e   :  { %v789_v42 = vmul.f32 0.5, %v788_v39  ;;  %988 = vmatpush.bf16.msrb.mxu0 %v2141_v40 }
 0x84f   :  { %v799_v49 = vmul.f32 %v2177_v44, %v796_v45 }
 0x850   :  { %v790_v43 = vsub.f32 1.5, %v789_v42  ;;  %v2143_v42 = vld [vmem:[%s2783_s4 + $0xa8] sm:$0xff] }
 0x851   :  { %v802_v53 = vadd.f32 %v2178_v48, %v799_v49  ;;  %1024 = vmatpush.bf16.msrb.mxu2 %v2143_v42  ;;  %v2144_v49 = vld [vmem:[%s2783_s4 + $0xc0] sm:$0xff] }
 0x852   :  { %v791_v46 = vmul.f32 %v2223_v36, %v790_v43  ;;  %v2145_v43 = vld [vmem:[%s2783_s4 + $0xc8] sm:$0xff] }
 0x853   :  { %1060 = vmatpush.bf16.msra.mxu1 %v2145_v43  ;;  %v2187_v43 = vld [vmem:[%s2784_s5 + $0xb] ss:$0 sm:$0xff] }
 0x854   :  { %v795_v47 = vsel %vm794_vm11, %v2223_v36, %v791_v46 }
 0x855   :  { %v797_v50 = vmul.f32 %v795_v47, %v763_v19  ;;  %v2140_v47 = vld [vmem:[%s2783_s4 + $0x80] sm:$0xff] }
 0x856   :  { %989 = vmatpush.bf16.msrb.mxu0 %v2140_v47 }
 0x857   :  { %v800_v52 = vmul.f32 %v2177_v44, %v797_v50  ;;  %1061 = vmatpush.bf16.msra.mxu1 %v2144_v49 }
 0x859   :  { %v803_v54 = vadd.f32 %v2178_v48, %v800_v52  ;;  %v2142_v48 = vld [vmem:[%s2783_s4 + $0xa0] sm:$0xff]  ;;  %v2151_v52 = vld [vmem:[%s2783_s4 + $0xb8] sm:$0xff] }
 0x85a   :  { %1025 = vmatpush.bf16.msrb.mxu2 %v2142_v48 }
 0x85b   :  { %v808_v55 = vpack.c.bf16 %v803_v54, %v802_v53  ;;  %1258 = vmatpush.bf16.msrb.mxu1 %v2151_v52 }
 0x85d   :  { %1942 = vmatmul.msk.bf16.vlgmr.msra.gmra.mxu2 %vm145_vm12, %v808_v55 }
 0x8e0   :  { %v837_v61 = vpop.f32.mrf.mxu2 }
 0x8e1   :  { %v838_v62 = vadd.f32 %v2179_v59, %v837_v61 }
 0x8e3   :  { %v842_v0 = vmul.f32 %v838_v62, %v838_v62 }
 0x8e5   :  { %v844_v1 = vmul.f32 %v842_v0, %v838_v62 }
 0x8e7   :  { %v846_v2 = vmul.f32 0.044715, %v844_v1 }
 0x8e8   :  { %v839_v3 = vpop.f32.mrf.mxu2 }
 0x8e9   :  { %v848_v4 = vadd.f32 %v846_v2, %v838_v62  ;;  %v840_v5 = vadd.f32 %v2179_v59, %v839_v3 }
 0x8eb   :  { %v850_v6 = vmul.f32 0.7978846, %v848_v4  ;;  %v843_v7 = vmul.f32 %v840_v5, %v840_v5 }
 0x8ed   :  { %v845_v8 = vmul.f32 %v843_v7, %v840_v5  ;;  %2224 = vtanh.f32 %v850_v6 }
 0x8ef   :  { %v847_v9 = vmul.f32 0.044715, %v845_v8 }
 0x8f1   :  { %v849_v10 = vadd.f32 %v847_v9, %v840_v5  ;;  %v2182_v9 = vld [vmem:[%s2787_s8 + $0x7] ss:$0 sm:$0xff] }
 0x8f3   :  { %v851_v11 = vmul.f32 0.7978846, %v849_v10  ;;  %v2225_v12 = vpop.eup %2224 }
 0x8f4   :  { %v854_v13 = vadd.f32 1.0, %v2225_v12 }
 0x8f5   :  { %2226 = vtanh.f32 %v851_v11 }
 0x8f6   :  { %v856_v15 = vmul.f32 0.5, %v854_v13 }
 0x8f8   :  { %v858_v17 = vmul.f32 %v856_v15, %v838_v62 }
 0x8fb   :  { %v2227_v14 = vpop.eup %2226 }
 0x8fc   :  { %v855_v16 = vadd.f32 1.0, %v2227_v14 }
 0x8fe   :  { %v857_v22 = vmul.f32 0.5, %v855_v16  ;;  %v2184_v16 = vld [vmem:[%s2784_s5 + $0xa] ss:$0 sm:$0xff] }
 0x900   :  { %v859_v18 = vmul.f32 %v857_v22, %v840_v5  ;;  %v2181_v5 = vld [vmem:[%s2787_s8 + $0x6] ss:$0 sm:$0xff] }
 0x902   :  { %v865_v19 = vpack.c.bf16 %v859_v18, %v858_v17  ;;  %v2185_v18 = vld [vmem:[%s2784_s5 + $0x8] ss:$0 sm:$0xff] }
 0x904   :  { %1955 = vmatmul.msk.bf16.vlgmr.msra.gmra.mxu3 %vm878_vm13, %v865_v19 }
 0x987   :  { %v897_v21 = vpop.f32.mrf.mxu3 }
 0x988   :  { %v898_v23 = vadd.f32 %v2180_v20, %v897_v21  ;;  %v2183_v21 = vld [vmem:[%s2784_s5 + $0x6] ss:$0 sm:$0xff] }
 0x98a   :  { %v902_v24 = vadd.f32 %v898_v23, %v802_v53 }
 0x98c   :  { %v906_v25 = vsel %vm145_vm12, %v902_v24, 0.0 }
 0x98d   :  { %907 = vadd.xlane.f32.xlu0 %v906_v25 }
 0x98f   :  { %v899_v26 = vpop.f32.mrf.mxu3 }
 0x990   :  { %v900_v28 = vadd.f32 %v2180_v20, %v899_v26 }
 0x992   :  { %v903_v29 = vadd.f32 %v900_v28, %v803_v54  ;;  %v2150_v54 = vld [vmem:[%s2783_s4 + $0xb0] sm:$0xff] }
 0x993   :  { %1259 = vmatpush.bf16.msrb.mxu1 %v2150_v54 }
 0x994   :  { %v909_v30 = vsel %vm145_vm12, %v903_v29, 0.0 }
 0x995   :  { %910 = vadd.xlane.f32.xlu1 %v909_v30  ;;  %v2153_v30 = vld [vmem:[%s2783_s4 + $0xd8] sm:$0xff] }
 0xa00   :  { %v908_v31 = vpop.xlane.xlu0 %907 }
 0xa01   :  { %v912_v27 = vmul.f32 %v908_v31, %v2384_v41 }
 0xa03   :  { %v914_v32 = vsub.f32 %v902_v24, %v912_v27 }
 0xa05   :  { %v916_v33 = vmul.f32 %v914_v32, %v914_v32 }
 0xa07   :  { %v918_v34 = vsel %vm145_vm12, %v916_v33, 0.0 }
 0xa08   :  { %v911_v35 = vpop.xlane.xlu1 %910  ;;  %919 = vadd.xlane.f32.xlu2 %v918_v34 }
 0xa09   :  { %v913_v36 = vmul.f32 %v911_v35, %v2384_v41  ;;  %v2152_v35 = vld [vmem:[%s2783_s4 + $0xd0] sm:$0xff] }
 0xa0b   :  { %v915_v37 = vsub.f32 %v903_v29, %v913_v36  ;;  %v2186_v29 = vld [vmem:[%s2784_s5 + $0x9] ss:$0 sm:$0xff] }
 0xa0d   :  { %v917_v38 = vmul.f32 %v915_v37, %v915_v37 }
 0xa0f   :  { %v921_v39 = vsel %vm145_vm12, %v917_v38, 0.0 }
 0xa10   :  { %922 = vadd.xlane.f32.xlu0 %v921_v39 }
 0xa7b   :  { %v920_v44 = vpop.xlane.xlu2 %919 }
 0xa7c   :  { %v924_v45 = vmul.f32 %v920_v44, %v2384_v41 }
 0xa7e   :  { %v926_v46 = vadd.f32 1e-12, %v924_v45 }
 0xa80   :  { %2228 = vrsqrt.f32 %v926_v46  ;;  %vm934_vm15 = vweird.f32 %v926_v46 }
 0xa83   :  { %v923_v50 = vpop.xlane.xlu0 %922 }
 0xa84   :  { %v925_v53 = vmul.f32 %v923_v50, %v2384_v41 }
 0xa86   :  { %v2229_v55 = vpop.eup %2228  ;;  %v927_v56 = vadd.f32 1e-12, %v925_v53 }
 0xa87   :  { %v929_v57 = vmul.f32 %v2229_v55, %v926_v46  ;;  %vm935_vm14 = vweird.f32 %v2229_v55 }
 0xa88   :  { %2230 = vrsqrt.f32 %v927_v56  ;;  %vm936_vm0 = vmor %vm934_vm15, %vm935_vm14  ;;  %vm944_vm2 = vweird.f32 %v927_v56 }
 0xa89   :  { %v930_v58 = vmul.f32 %v2229_v55, %v929_v57 }
 0xa8b   :  { %v931_v59 = vmul.f32 0.5, %v930_v58 }
 0xa8d   :  { %v932_v60 = vsub.f32 1.5, %v931_v59  ;;  %v2149_v59 = vld [vmem:[%s2783_s4 + $0x98] sm:$0xff] }
 0xa8e   :  { %v2231_v61 = vpop.eup %2230 }
 0xa8f   :  { %v933_v62 = vmul.f32 %v2229_v55, %v932_v60  ;;  %v939_v0 = vmul.f32 %v2231_v61, %v927_v56  ;;  %vm945_vm1 = vweird.f32 %v2231_v61  ;;  %v2148_v60 = vld [vmem:[%s2783_s4 + $0x90] sm:$0xff] }
 0xa90   :  { %vm946_vm3 = vmor %vm944_vm2, %vm945_vm1  ;;  %vm1708_vm1 = vcmask 1040384   ;;  %vm1775_vm2 = vcmask 1041408  }
 0xa91   :  { %v940_v1 = vmul.f32 %v2231_v61, %v939_v0  ;;  %v937_v2 = vsel %vm936_vm0, %v2229_v55, %v933_v62 }
 0xa92   :  { %v948_v6 = vmul.f32 %v937_v2, %v914_v32 }
 0xa93   :  { %v941_v3 = vmul.f32 0.5, %v940_v1 }
 0xa94   :  { %v951_v10 = vmul.f32 %v2181_v5, %v948_v6 }
 0xa95   :  { %v942_v4 = vsub.f32 1.5, %v941_v3 }
 0xa96   :  { %v2603_v13 = vadd.f32 %v2182_v9, %v951_v10 }
 0xa97   :  { %v943_v7 = vmul.f32 %v2231_v61, %v942_v4 }
 0xa99   :  { %v947_v8 = vsel %vm946_vm3, %v2231_v61, %v943_v7  ;;  %v2188_v7 = vld [vmem:[%s2784_s5 + $0x7] ss:$0 sm:$0xff] }
 0xa9a   :  { %v949_v11 = vmul.f32 %v947_v8, %v915_v37 }
 0xa9c   :  { %v952_v12 = vmul.f32 %v2181_v5, %v949_v11 }
 0xa9e   :  { %v2605_v14 = vadd.f32 %v2182_v9, %v952_v12 }
 0xaa0   :  { %v2609_v15 = vpack.c.bf16 %v2605_v14, %v2603_v13 }
 0xaa2   :  { %1969 = vmatmul.msk.bf16.vlgmr.msrb.gmra.mxu0 %vm145_vm12, %v2609_v15  ;;  %1983 = vmatmul.msk.bf16.vlgmr.msrb.gmra.mxu2 %vm145_vm12, %v2609_v15 }
 0xaa3   :  { %1997 = vmatmul.msk.bf16.vlgmr.msra.gmra.mxu1 %vm145_vm12, %v2609_v15 }
 0xab3   :  { %2035 = vmatmul.msk.bf16.vlgmr.msrb.gmra.mxu1 %vm145_vm12, %v2609_v15 }
 0xb1f   :  { %v991_v19 = vpop.f32.mrf.mxu0 }
 0xb20   :  { %v1063_v22 = vpop.f32.mrf.mxu1  ;;  %v992_v26 = vadd.f32 %v2183_v21, %v991_v19 }
 0xb21   :  { %v1064_v17 = vadd.f32 %v2184_v16, %v1063_v22 }
 0xb23   :  { %1123 = vmatpush.msra.mxu0 %v1064_v17 }
 0xb25   :  { %v1027_v20 = vpop.f32.mrf.mxu2  ;;  %1222 = vmatpush.bf16.msrb.mxu0 %v2149_v59 }
 0xb26   :  { %v1028_v23 = vadd.f32 %v2185_v18, %v1027_v20 }
 0xb27   :  { %v993_v31 = vpop.f32.mrf.mxu0 }
 0xb28   :  { %v1065_v24 = vpop.f32.mrf.mxu1  ;;  %1998 = vmatpush.xpose.msk.msrb.mxu3 %vm317_vm4, %v1028_v23  ;;  %v994_v33 = vadd.f32 %v2183_v21, %v993_v31 }
 0xb29   :  { %v1066_v25 = vadd.f32 %v2184_v16, %v1065_v24  ;;  %1223 = vmatpush.bf16.msrb.mxu0 %v2148_v60 }
 0xb2b   :  { %1999 = vmatmul.msk.f32.vlgmr.msrb.gmra.mxu3 %vm317_vm4, %v992_v26 }
 0xb2c   :  { %1183 = vmatpush.msra.mxu3 %v1066_v25 }
 0xb2d   :  { %v1029_v28 = vpop.f32.mrf.mxu2 }
 0xb2e   :  { %v1030_v27 = vadd.f32 %v2185_v18, %v1029_v28 }
 0xb30   :  { %v1261_v32 = vpop.f32.mrf.mxu1  ;;  %2001 = vmatpush.xpose.msk.msra.mxu2 %vm317_vm4, %v1030_v27  ;;  %v2146_v27 = vld [vmem:[%s2783_s4 + $0xe0] sm:$0xff] }
 0xb31   :  { %v1262_v34 = vadd.f32 %v2186_v29, %v1261_v32  ;;  %v1475_v32 = vsel %vm317_vm4, %v2146_v27, 0  ;;  %v2191_v27 = vld [vmem:[%s2787_s8 + $0xa] ss:$0 sm:$0xff] }
 0xb33   :  { %2050 = vmatpush.xpose.msk.msrb.mxu3 %vm317_vm4, %v1262_v34  ;;  %2002 = vmatmul.msk.f32.vlgmr.msra.gmra.mxu2 %vm317_vm4, %v994_v33  ;;  %v2155_v33 = vld [vmem:[%s2783_s4 + $0xf8] sm:$0xff] }
 0xb34   :  { %1294 = vmatpush.bf16.msrb.mxu2 %v2153_v30  ;;  %v2147_v30 = vld [vmem:[%s2783_s4 + $0xe8] sm:$0xff]  ;;  %v1445_v34 = vsel %vm317_vm4, %v2155_v33, 0 }
 0xb35   :  { %v1478_v31 = vsel %vm317_vm4, %v2147_v30, 0 }
 0xb38   :  { %1295 = vmatpush.bf16.msrb.mxu2 %v2152_v35  ;;  %v1263_v62 = vpop.f32.mrf.mxu1 }
 0xb39   :  { %v1264_v3 = vadd.f32 %v2186_v29, %v1263_v62 }
 0xb3b   :  { %2049 = vmatmul.msk.bf16.vlgmr.msrb.gmra.mxu2 %vm145_vm12, %v2609_v15 }
 0xb3c   :  { %1453 = vmatpush.bf16.xpose.msra.mxu2 %v1445_v34 }
 0xbae   :  { %v1091_v36 = vpop.f32.mrf.mxu3 }
 0xbaf   :  { %v1092_v37 = vadd.f32 %v1091_v36, %v2467_v51 }
 0xbb1   :  { %v1094_v38 = vsel %vm344_vm5, %v1092_v37, -inf }
 0xbb2   :  { %1095 = vmax.xlane.f32.xlu1 %v1094_v38 }
 0xbb6   :  { %v1151_v39 = vpop.f32.mrf.mxu2 }
 0xbb7   :  { %v1152_v40 = vadd.f32 %v1151_v39, %v2475_v63 }
 0xbb9   :  { %v1154_v42 = vsel %vm344_vm5, %v1152_v40, -inf }
 0xbba   :  { %1155 = vmax.xlane.f32.xlu0 %v1154_v42 }
 0xbbe   :  { %v1297_v44 = vpop.f32.mrf.mxu2 }
 0xbbf   :  { %v1298_v45 = vadd.f32 %v2187_v43, %v1297_v44 }
 0xbc6   :  { %v1299_v46 = vpop.f32.mrf.mxu2 }
 0xbc7   :  { %v1300_v47 = vadd.f32 %v2187_v43, %v1299_v46  ;;  %v2154_v43 = vld [vmem:[%s2783_s4 + $0xf0] sm:$0xff] }
 0xbc8   :  { %v1442_v44 = vsel %vm317_vm4, %v2154_v43, 0 }
 0xbc9   :  { %1417 = vmatpush.msra.mxu1 %v1300_v47  ;;  %1454 = vmatpush.bf16.xpose.msra.mxu2 %v1442_v44 }
 0xc25   :  { %v1096_v48 = vpop.xlane.xlu1 %1095 }
 0xc26   :  { %v1097_v49 = vsub.f32 %v1092_v37, %v1096_v48 }
 0xc28   :  { %v1098_v50 = vmul.f32 1.442695, %v1097_v49 }
 0xc2a   :  { %2232 = vpow2.f32 %v1098_v50 }
 0xc2d   :  { %v1156_v52 = vpop.xlane.xlu0 %1155 }
 0xc2e   :  { %v1157_v53 = vsub.f32 %v1152_v40, %v1156_v52  ;;  %v2189_v52 = vld [vmem:[%s2787_s8 + $0x8] ss:$0 sm:$0xff] }
 0xc30   :  { %v1158_v54 = vmul.f32 1.442695, %v1157_v53  ;;  %v2233_v55 = vpop.eup %2232 }
 0xc31   :  { %v1100_v56 = vsel %vm344_vm5, %v2233_v55, 0.0 }
 0xc32   :  { %2234 = vpow2.f32 %v1158_v54  ;;  %1101 = vadd.xlane.f32.xlu2 %v1100_v56 }
 0xc38   :  { %v2235_v57 = vpop.eup %2234 }
 0xc39   :  { %v1160_v58 = vsel %vm344_vm5, %v2235_v57, 0.0 }
 0xc3a   :  { %1161 = vadd.xlane.f32.xlu1 %v1160_v58 }
 0xca5   :  { %v1102_v61 = vpop.xlane.xlu2 %1101 }
 0xca6   :  { %2236 = vrcp.f32 %v1102_v61 }
 0xcac   :  { %v2237_v0 = vpop.eup %2236 }
 0xcad   :  { %v1162_v1 = vpop.xlane.xlu1 %1161  ;;  %v1104_v2 = vmul.f32 %v2237_v0, %v2233_v55 }
 0xcae   :  { %2238 = vrcp.f32 %v1162_v1 }
 0xcaf   :  { %2000 = vmatmul.msk.f32.vlgmr.msra.gmra.mxu0 %vm344_vm5, %v1104_v2 }
 0xcb0   :  { %2053 = vmatpush.xpose.msk.msra.mxu0 %vm317_vm4, %v1264_v3 }
 0xcb4   :  { %v2239_v4 = vpop.eup %2238 }
 0xcb5   :  { %v1164_v5 = vmul.f32 %v2239_v4, %v2235_v57 }
 0xcb7   :  { %2003 = vmatmul.msk.f32.vlgmr.msra.gmra.mxu3 %vm344_vm5, %v1164_v5  ;;  %2021 = vmatmul.msk.bf16.vlgmr.msrb.gmra.mxu0 %vm145_vm12, %v2609_v15 }
 0xcb8   :  { %1357 = vmatpush.msra.mxu3 %v1298_v45 }
 0xd2c   :  { %v1125_v6 = vpop.f32.mrf.mxu0 }
 0xd34   :  { %v1225_v8 = vpop.f32.mrf.mxu0 }
 0xd35   :  { %v1226_v9 = vadd.f32 %v2188_v7, %v1225_v8 }
 0xd37   :  { %2051 = vmatmul.msk.f32.vlgmr.msrb.gmra.mxu3 %vm317_vm4, %v1226_v9 }
 0xd38   :  { %1486 = vmatpush.bf16.xpose.msrb.mxu3 %v1478_v31 }
 0xd3a   :  { %v1185_v12 = vpop.f32.mrf.mxu3 }
 0xd3b   :  { %v1193_v42 = vpack.c.bf16 %v1185_v12, %v1125_v6 }
 0xd3c   :  { %v1227_v10 = vpop.f32.mrf.mxu0 }
 0xd3d   :  { %v1228_v11 = vadd.f32 %v2188_v7, %v1227_v10 }
 0xd3f   :  { %2054 = vmatmul.msk.f32.vlgmr.msra.gmra.mxu0 %vm317_vm4, %v1228_v11  ;;  %v2156_v11 = vld [vmem:[%s2785_s6 + $0x20] sm:$0xff] }
 0xd40   :  { %1487 = vmatpush.bf16.xpose.msrb.mxu3 %v1475_v32 }
 0xdba   :  { %v1325_v16 = vpop.f32.mrf.mxu3 }
 0xdbb   :  { %v1326_v22 = vadd.f32 %v1325_v16, %v2467_v51 }
 0xdbc   :  { %v1385_v17 = vpop.f32.mrf.mxu0 }
 0xdbd   :  { %v1386_v15 = vadd.f32 %v1385_v17, %v2475_v63  ;;  %v1328_v18 = vsel %vm344_vm5, %v1326_v22, -inf }
 0xdbe   :  { %1329 = vmax.xlane.f32.xlu2 %v1328_v18 }
 0xdbf   :  { %v1388_v19 = vsel %vm344_vm5, %v1386_v15, -inf }
 0xdc0   :  { %1389 = vmax.xlane.f32.xlu0 %v1388_v19 }
 0xe31   :  { %v1330_v20 = vpop.xlane.xlu2 %1329 }
 0xe32   :  { %v1331_v21 = vsub.f32 %v1326_v22, %v1330_v20 }
 0xe33   :  { %v1390_v23 = vpop.xlane.xlu0 %1389 }
 0xe34   :  { %v1332_v24 = vmul.f32 1.442695, %v1331_v21  ;;  %v1391_v25 = vsub.f32 %v1386_v15, %v1390_v23 }
 0xe36   :  { %2240 = vpow2.f32 %v1332_v24  ;;  %v1392_v26 = vmul.f32 1.442695, %v1391_v25 }
 0xe38   :  { %2242 = vpow2.f32 %v1392_v26 }
 0xe3c   :  { %v2241_v28 = vpop.eup %2240 }
 0xe3d   :  { %v1334_v51 = vsel %vm344_vm5, %v2241_v28, 0.0 }
 0xe3e   :  { %v2243_v29 = vpop.eup %2242  ;;  %1335 = vadd.xlane.f32.xlu1 %v1334_v51 }
 0xe3f   :  { %v1394_v63 = vsel %vm344_vm5, %v2243_v29, 0.0 }
 0xe40   :  { %1395 = vadd.xlane.f32.xlu2 %v1394_v63 }
 0xeb1   :  { %v1336_v35 = vpop.xlane.xlu1 %1335 }
 0xeb2   :  { %2244 = vrcp.f32 %v1336_v35 }
 0xeb3   :  { %v1396_v36 = vpop.xlane.xlu2 %1395 }
 0xeb4   :  { %2246 = vrcp.f32 %v1396_v36 }
 0xeb8   :  { %v2245_v37 = vpop.eup %2244 }
 0xeb9   :  { %v1338_v38 = vmul.f32 %v2245_v37, %v2241_v28 }
 0xeba   :  { %v2247_v39 = vpop.eup %2246 }
 0xebb   :  { %v1398_v40 = vmul.f32 %v2247_v39, %v2243_v29  ;;  %2052 = vmatmul.msk.f32.vlgmr.msra.gmra.mxu3 %vm344_vm5, %v1338_v38  ;;  %v2190_v29 = vld [vmem:[%s2787_s8 + $0x9] ss:$0 sm:$0xff]  ;;  %v2159_v38 = vld [vmem:[%s2785_s6 + $0x38] sm:$0xff] }
 0xebc   :  { %v1635_v39 = vsel %vm878_vm13, %v2159_v38, 0 }
 0xebd   :  { %2055 = vmatmul.msk.f32.vlgmr.msra.gmra.mxu1 %vm344_vm5, %v1398_v40  ;;  %v2158_v40 = vld [vmem:[%s2785_s6 + $0x30] sm:$0xff] }
 0xebe   :  { %1643 = vmatpush.bf16.xpose.msrb.mxu1 %v1635_v39  ;;  %v1632_v43 = vsel %vm878_vm13, %v2158_v40, 0 }
 0xec3   :  { %2077 = vmatmul.msk.bf16.vlgmr.msrb.gmra.mxu3 %vm317_vm4, %v1193_v42  ;;  %v2192_v42 = vld [vmem:[%s2786_s7 + $0x1] ss:$0 sm:$0xff] }
 0xec6   :  { %1644 = vmatpush.bf16.xpose.msrb.mxu1 %v1632_v43 }
 0xf3a   :  { %v1419_v45 = vpop.f32.mrf.mxu1 }
 0xf3e   :  { %v1359_v46 = vpop.f32.mrf.mxu3 }
 0xf3f   :  { %v1427_v47 = vpack.c.bf16 %v1419_v45, %v1359_v46 }
 0xf41   :  { %2068 = vmatmul.msk.bf16.vlgmr.msra.gmra.mxu2 %vm317_vm4, %v1427_v47 }
 0xf46   :  { %v1489_v48 = vpop.f32.mrf.mxu3 }
 0xf4e   :  { %v1491_v56 = vpop.f32.mrf.mxu3 }
 0xfc4   :  { %v1456_v49 = vpop.f32.mrf.mxu2 }
 0xfc5   :  { %v1490_v50 = vadd.f32 %v1489_v48, %v1456_v49 }
 0xfc7   :  { %v1494_v53 = vadd.f32 %v1490_v50, %v2603_v13 }
 0xfc9   :  { %v1498_v54 = vadd.f32 %v2189_v52, %v1494_v53 }
 0xfcb   :  { %v1502_v55 = vsel %vm145_vm12, %v1498_v54, 0.0 }
 0xfcc   :  { %v1458_v57 = vpop.f32.mrf.mxu2  ;;  %1503 = vadd.xlane.f32.xlu0 %v1502_v55 }
 0xfcd   :  { %v1492_v58 = vadd.f32 %v1491_v56, %v1458_v57 }
 0xfcf   :  { %v1495_v59 = vadd.f32 %v1492_v58, %v2605_v14  ;;  %v2157_v14 = vld [vmem:[%s2785_s6 + $0x28] sm:$0xff] }
 0xfd0   :  { %1584 = vmatpush.bf16.msrb.mxu0 %v2157_v14 }
 0xfd1   :  { %v1499_v60 = vadd.f32 %v2189_v52, %v1495_v59 }
 0xfd3   :  { %v1505_v61 = vsel %vm145_vm12, %v1499_v60, 0.0 }
 0xfd4   :  { %1506 = vadd.xlane.f32.xlu1 %v1505_v61  ;;  %1585 = vmatpush.bf16.msrb.mxu0 %v2156_v11 }
0x103f   :  { %v1504_v62 = vpop.xlane.xlu0 %1503 }
0x1040   :  { %v1508_v0 = vmul.f32 %v1504_v62, %v2384_v41 }
0x1042   :  { %v1510_v1 = vsub.f32 %v1498_v54, %v1508_v0 }
0x1044   :  { %v1512_v2 = vmul.f32 %v1510_v1, %v1510_v1 }
0x1046   :  { %v1514_v13 = vsel %vm145_vm12, %v1512_v2, 0.0 }
0x1047   :  { %v1507_v3 = vpop.xlane.xlu1 %1506  ;;  %1515 = vadd.xlane.f32.xlu2 %v1514_v13 }
0x1048   :  { %v1509_v4 = vmul.f32 %v1507_v3, %v2384_v41 }
0x104a   :  { %v1511_v5 = vsub.f32 %v1499_v60, %v1509_v4  ;;  %v2193_v4 = vld [vmem:[%s2787_s8 + $0xb] ss:$0 sm:$0xff] }
0x104c   :  { %v1513_v6 = vmul.f32 %v1511_v5, %v1511_v5 }
0x104e   :  { %v1517_v7 = vsel %vm145_vm12, %v1513_v6, 0.0 }
0x104f   :  { %1518 = vadd.xlane.f32.xlu0 %v1517_v7 }
0x10ba   :  { %v1516_v8 = vpop.xlane.xlu2 %1515 }
0x10bb   :  { %v1520_v9 = vmul.f32 %v1516_v8, %v2384_v41 }
0x10bd   :  { %v1522_v10 = vadd.f32 1e-12, %v1520_v9 }
0x10bf   :  { %2248 = vrsqrt.f32 %v1522_v10  ;;  %vm1530_vm5 = vweird.f32 %v1522_v10 }
0x10c2   :  { %v1519_v12 = vpop.xlane.xlu0 %1518 }
0x10c3   :  { %v1521_v16 = vmul.f32 %v1519_v12, %v2384_v41 }
0x10c5   :  { %v2249_v22 = vpop.eup %2248  ;;  %v1523_v17 = vadd.f32 1e-12, %v1521_v16 }
0x10c6   :  { %v1525_v15 = vmul.f32 %v2249_v22, %v1522_v10  ;;  %vm1531_vm4 = vweird.f32 %v2249_v22 }
0x10c7   :  { %2250 = vrsqrt.f32 %v1523_v17  ;;  %vm1532_vm6 = vmor %vm1530_vm5, %vm1531_vm4  ;;  %vm1540_vm8 = vweird.f32 %v1523_v17 }
0x10c8   :  { %v1526_v18 = vmul.f32 %v2249_v22, %v1525_v15 }
0x10ca   :  { %v1527_v19 = vmul.f32 0.5, %v1526_v18 }
0x10cc   :  { %v1528_v20 = vsub.f32 1.5, %v1527_v19 }
0x10cd   :  { %v2251_v21 = vpop.eup %2250 }
0x10ce   :  { %v1529_v23 = vmul.f32 %v2249_v22, %v1528_v20  ;;  %v1535_v24 = vmul.f32 %v2251_v21, %v1523_v17  ;;  %vm1541_vm7 = vweird.f32 %v2251_v21 }
0x10cf   :  { %vm1542_vm9 = vmor %vm1540_vm8, %vm1541_vm7 }
0x10d0   :  { %v1536_v25 = vmul.f32 %v2251_v21, %v1535_v24  ;;  %v1533_v26 = vsel %vm1532_vm6, %v2249_v22, %v1529_v23 }
0x10d1   :  { %v1544_v63 = vmul.f32 %v1533_v26, %v1510_v1  ;;  %v2161_v26 = vld [vmem:[%s2788_s9 + $0x8] sm:$0xff] }
0x10d2   :  { %v1537_v28 = vmul.f32 0.5, %v1536_v25  ;;  %1738 = vmatpush.bf16.msrb.mxu2 %v2161_v26 }
0x10d3   :  { %v1547_v32 = vmul.f32 %v2190_v29, %v1544_v63 }
0x10d4   :  { %v1538_v51 = vsub.f32 1.5, %v1537_v28 }
0x10d5   :  { %v1550_v35 = vadd.f32 %v2191_v27, %v1547_v32 }
0x10d6   :  { %v1539_v30 = vmul.f32 %v2251_v21, %v1538_v51  ;;  %v2160_v51 = vld [vmem:[%s2788_s9] sm:$0xff] }
0x10d7   :  { %1739 = vmatpush.bf16.msrb.mxu2 %v2160_v51 }
0x10d8   :  { %v1543_v31 = vsel %vm1542_vm9, %v2251_v21, %v1539_v30 }
0x10d9   :  { %v1545_v33 = vmul.f32 %v1543_v31, %v1511_v5 }
0x10db   :  { %v1548_v34 = vmul.f32 %v2190_v29, %v1545_v33 }
0x10dd   :  { %v1551_v36 = vadd.f32 %v2191_v27, %v1548_v34 }
0x10df   :  { %v1557_v37 = vpack.c.bf16 %v1551_v36, %v1550_v35 }
0x10e1   :  { %2091 = vmatmul.msk.bf16.vlgmr.msrb.gmra.mxu0 %vm145_vm12, %v1557_v37 }
0x115e   :  { %v1587_v44 = vpop.f32.mrf.mxu0 }
0x115f   :  { %v1588_v45 = vadd.f32 %v2192_v42, %v1587_v44 }
0x1161   :  { %v1592_v46 = vmul.f32 %v1588_v45, %v1588_v45 }
0x1163   :  { %v1594_v47 = vmul.f32 %v1592_v46, %v1588_v45 }
0x1165   :  { %v1596_v48 = vmul.f32 0.044715, %v1594_v47  ;;  %v2195_v47 = vld [vmem:[%s2787_s8 + $0xd] ss:$0 sm:$0xff] }
0x1166   :  { %v1589_v49 = vpop.f32.mrf.mxu0 }
0x1167   :  { %v1598_v50 = vadd.f32 %v1596_v48, %v1588_v45  ;;  %v1590_v52 = vadd.f32 %v2192_v42, %v1589_v49 }
0x1169   :  { %v1600_v53 = vmul.f32 0.7978846, %v1598_v50  ;;  %v1593_v54 = vmul.f32 %v1590_v52, %v1590_v52 }
0x116b   :  { %v1595_v55 = vmul.f32 %v1593_v54, %v1590_v52  ;;  %2252 = vtanh.f32 %v1600_v53 }
0x116d   :  { %v1597_v56 = vmul.f32 0.044715, %v1595_v55 }
0x116f   :  { %v1599_v57 = vadd.f32 %v1597_v56, %v1590_v52  ;;  %v1749_v56 = vld [vmem:[%s2789_s10 + $0x18] sm:$0xff] }
0x1170   :  { %1767 = vmatpush.msra.mxu0 %v1749_v56 }
0x1171   :  { %v1601_v58 = vmul.f32 0.7978846, %v1599_v57  ;;  %v2253_v59 = vpop.eup %2252  ;;  %v1748_v57 = vld [vmem:[%s2789_s10 + $0x10] sm:$0xff] }
0x1172   :  { %v1604_v60 = vadd.f32 1.0, %v2253_v59  ;;  %1768 = vmatpush.msra.mxu0 %v1748_v57  ;;  %v1746_v59 = vld [vmem:[%s2789_s10] sm:$0xff] }
0x1173   :  { %2254 = vtanh.f32 %v1601_v58  ;;  %v1747_v58 = vld [vmem:[%s2789_s10 + $0x8] sm:$0xff] }
0x1174   :  { %v1606_v62 = vmul.f32 0.5, %v1604_v60  ;;  %1769 = vmatpush.msra.mxu0 %v1747_v58  ;;  %v2196_v60 = vld [vmem:[%s2787_s8 + $0xe] ss:$0 sm:$0xff] }
0x1176   :  { %v1608_v2 = vmul.f32 %v1606_v62, %v1588_v45  ;;  %1770 = vmatpush.msra.mxu0 %v1746_v59 }
0x1179   :  { %v2255_v61 = vpop.eup %2254 }
0x117a   :  { %v1605_v0 = vadd.f32 1.0, %v2255_v61 }
0x117c   :  { %v1607_v1 = vmul.f32 0.5, %v1605_v0 }
0x117e   :  { %v1609_v13 = vmul.f32 %v1607_v1, %v1590_v52 }
0x1180   :  { %v1615_v3 = vpack.c.bf16 %v1609_v13, %v1608_v2  ;;  %v2197_v2 = vld [vmem:[%s2789_s10 + $0x20] ss:$0 sm:$0xff] }
0x1182   :  { %2104 = vmatmul.msk.bf16.vlgmr.msrb.gmra.mxu1 %vm878_vm13, %v1615_v3 }
0x11ff   :  { %v1646_v5 = vpop.f32.mrf.mxu1 }
0x1200   :  { %v1647_v6 = vadd.f32 %v2193_v4, %v1646_v5 }
0x1202   :  { %v1651_v7 = vadd.f32 %v1647_v6, %v1550_v35 }
0x1204   :  { %v1655_v14 = vsel %vm145_vm12, %v1651_v7, 0.0 }
0x1205   :  { %1656 = vadd.xlane.f32.xlu2 %v1655_v14 }
0x1207   :  { %v1648_v8 = vpop.f32.mrf.mxu1 }
0x1208   :  { %v1649_v9 = vadd.f32 %v2193_v4, %v1648_v8 }
0x120a   :  { %v1652_v10 = vadd.f32 %v1649_v9, %v1551_v36 }
0x120c   :  { %v1658_v11 = vsel %vm145_vm12, %v1652_v10, 0.0 }
0x120d   :  { %1659 = vadd.xlane.f32.xlu1 %v1658_v11 }
0x1278   :  { %v1657_v12 = vpop.xlane.xlu2 %1656 }
0x1279   :  { %v1661_v16 = vmul.f32 %v1657_v12, %v2384_v41 }
0x127b   :  { %v1663_v22 = vsub.f32 %v1651_v7, %v1661_v16 }
0x127d   :  { %v1665_v17 = vmul.f32 %v1663_v22, %v1663_v22 }
0x127f   :  { %v1667_v15 = vsel %vm145_vm12, %v1665_v17, 0.0 }
0x1280   :  { %v1660_v18 = vpop.xlane.xlu1 %1659  ;;  %1668 = vadd.xlane.f32.xlu1 %v1667_v15 }
0x1281   :  { %v1662_v19 = vmul.f32 %v1660_v18, %v2384_v41 }
0x1283   :  { %v1664_v20 = vsub.f32 %v1652_v10, %v1662_v19 }
0x1285   :  { %v1666_v21 = vmul.f32 %v1664_v20, %v1664_v20 }
0x1287   :  { %v1670_v23 = vsel %vm145_vm12, %v1666_v21, 0.0 }
0x1288   :  { %1671 = vadd.xlane.f32.xlu0 %v1670_v23 }
0x12f3   :  { %v1669_v24 = vpop.xlane.xlu1 %1668 }
0x12f4   :  { %v1673_v25 = vmul.f32 %v1669_v24, %v2384_v41 }
0x12f6   :  { %v1675_v28 = vadd.f32 1e-12, %v1673_v25 }
0x12f8   :  { %2256 = vrsqrt.f32 %v1675_v28  ;;  %vm1683_vm11 = vweird.f32 %v1675_v28 }
0x12fb   :  { %v1672_v29 = vpop.xlane.xlu0 %1671 }
0x12fc   :  { %v1674_v63 = vmul.f32 %v1672_v29, %v2384_v41  ;;  %v2194_v41 = vld [vmem:[%s2787_s8 + $0xc] ss:$0 sm:$0xff] }
0x12fe   :  { %v2257_v30 = vpop.eup %2256  ;;  %v1676_v31 = vadd.f32 1e-12, %v1674_v63 }
0x12ff   :  { %v1678_v27 = vmul.f32 %v2257_v30, %v1675_v28  ;;  %vm1684_vm10 = vweird.f32 %v2257_v30 }
0x1300   :  { %2258 = vrsqrt.f32 %v1676_v31  ;;  %vm1685_vm13 = vmor %vm1683_vm11, %vm1684_vm10  ;;  %vm1693_vm15 = vweird.f32 %v1676_v31 }
0x1301   :  { %v1679_v32 = vmul.f32 %v2257_v30, %v1678_v27 }
0x1303   :  { %v1680_v33 = vmul.f32 0.5, %v1679_v32 }
0x1305   :  { %v1681_v34 = vsub.f32 1.5, %v1680_v33 }
0x1306   :  { %v2259_v35 = vpop.eup %2258 }
0x1307   :  { %v1688_v36 = vmul.f32 %v2259_v35, %v1676_v31  ;;  %v1682_v37 = vmul.f32 %v2257_v30, %v1681_v34  ;;  %vm1694_vm14 = vweird.f32 %v2259_v35 }
0x1308   :  { %vm1695_vm0 = vmor %vm1693_vm15, %vm1694_vm14 }
0x1309   :  { %v1689_v38 = vmul.f32 %v2259_v35, %v1688_v36  ;;  %v1686_v40 = vsel %vm1685_vm13, %v2257_v30, %v1682_v37 }
0x130a   :  { %v1697_v44 = vmul.f32 %v1686_v40, %v1663_v22 }
0x130b   :  { %v1690_v39 = vmul.f32 0.5, %v1689_v38 }
0x130c   :  { %v1700_v48 = vmul.f32 %v2194_v41, %v1697_v44 }
0x130d   :  { %v1691_v42 = vsub.f32 1.5, %v1690_v39 }
0x130e   :  { %v1703_v52 = vadd.f32 %v2195_v47, %v1700_v48 }
0x130f   :  { %v1692_v43 = vmul.f32 %v2259_v35, %v1691_v42 }
0x1311   :  { %v1696_v45 = vsel %vm1695_vm0, %v2259_v35, %v1692_v43 }
0x1312   :  { %v1698_v46 = vmul.f32 %v1696_v45, %v1664_v20 }
0x1314   :  { %v1701_v49 = vmul.f32 %v2194_v41, %v1698_v46 }
0x1316   :  { %v1704_v50 = vadd.f32 %v2195_v47, %v1701_v49 }
0x1318   :  { %v1706_v53 = vrot.slane %v1704_v50, 7 }
0x131a   :  { %v1709_v54 = vsel %vm1708_vm1, %v1703_v52, %v1706_v53 }
0x131b   :  { %v1714_v55 = vpack.c.bf16 %v1709_v54, %v1709_v54 }
0x131d   :  { %2113 = vmatmul.msk.bf16.vlgmr.msrb.gmra.mxu2 %vm145_vm12, %v1714_v55 }
0x13a0   :  { %v1741_v61 = vpop.f32.mrf.mxu2 }
0x13a1   :  { %v1742_v62 = vadd.f32 %v2196_v60, %v1741_v61 }
0x13a3   :  { %2260 = vtanh.f32 %v1742_v62 }
0x13a8   :  { %v1743_v0 = vpop.f32.mrf.mxu2 }
0x13a9   :  { %v2261_v1 = vpop.eup %2260 }
0x13aa   :  { %2114 = vmatmul.msk.f32.vlgmr.msra.gmra.mxu0 %vm145_vm12, %v2261_v1 }
0x1427   :  { %v1772_v13 = vpop.f32.mrf.mxu0 }
0x1428   :  { %v1773_v3 = vadd.f32 %v2197_v2, %v1772_v13 }
0x142a   :  { %v1776_v4 = vsel %vm1775_vm2, %v1773_v3, 0.0 }
0x142b   :  { %1777 = vst [vmem:[#allocation2] sm:$0xff] %v1776_v4 }
0x142c   :  { %1788 = dma.vmem_to_hbm [thread:$0]  %s1784_s26, 128, %s1786_s2, [#allocation3]  }
0x142d   :  { %2286 = dma.done.wait [#allocation3], 128  }
0x142e   :  { %2287 = vsyncadd [#allocation3], 4294967168 }
0x142f   :  { %1793 = vsyncpa [#allocation3], 1 }

</bundles_post_ra>
